<compile_context>
chip_gen: v7x
topology: tpu7x:2x2x1
jax: 0.10.0
libtpu: 0.0.40
codegen_flags: <defaults>
</compile_context>

<pallas_src>
import jax
import jax.numpy as jnp
from jax import lax
from jax.experimental import pallas as pl
from jax.experimental.pallas import tpu as pltpu


def bottleneck_kernel(xwin_ref, w1_ref, w2_ref, w3_ref, b1_ref, b2_ref, b3_ref,
                      o_ref, hpad_ref):
    TH, W, Cout = o_ref.shape              # output tile: (TH, W, Cout)
    Cin = xwin_ref.shape[-1]               # input tile:  (TH+2, W, Cin) (1-row halo each side)
    width = w1_ref.shape[1]

    t = pl.program_id(1)                   # H-tile index
    nt = pl.num_programs(1)

    # ---- conv1 (1x1, BN scale folded) + bias + ReLU on all TH+2 rows (halo incl.) ----
    xw = xwin_ref[...].reshape((TH + 2) * W, Cin).astype(jnp.bfloat16)
    h1 = jnp.dot(xw, w1_ref[...], preferred_element_type=jnp.float32)
    h1 = jnp.maximum(h1 + b1_ref[...], 0.0).reshape(TH + 2, W, width)

    # Halo rows outside the image must be zeros for conv2's SAME padding
    # (not relu(bias)); interior-tile halo rows stay = true conv1 output.
    row = lax.broadcasted_iota(jnp.int32, (TH + 2, W, width), 0)
    g = t * TH - 1 + row                   # global H index of each scratch row
    valid = jnp.logical_and(g >= 0, g < nt * TH)
    h1 = jnp.where(valid, h1, 0.0)

    # ---- spatially padded scratch: zero only the 1-wide W border columns ----
    zcol = jnp.zeros((TH + 2, 1, width), jnp.float32)
    hpad_ref[:, 0:1, :] = zcol
    hpad_ref[:, W + 1:W + 2, :] = zcol
    hpad_ref[:, 1:W + 1, :] = h1           # all TH+2 rows rewritten every tile

    # ---- conv2 (3x3, stride 1) as ONE im2col matmul: K = 9*width ----
    patches = jnp.concatenate(
        [hpad_ref[dy:dy + TH, dx:dx + W, :] for dy in range(3) for dx in range(3)],
        axis=-1)                           # (TH, W, 9*width)
    patches = patches.reshape(TH * W, 9 * width).astype(jnp.bfloat16)
    h2 = jnp.dot(patches, w2_ref[...], preferred_element_type=jnp.float32)
    h2 = jnp.maximum(h2 + b2_ref[...], 0.0)

    # ---- conv3 (1x1) + bias + residual + ReLU ----
    h3 = jnp.dot(h2.astype(jnp.bfloat16), w3_ref[...],
                 preferred_element_type=jnp.float32) + b3_ref[...]
    identity = xwin_ref[1:TH + 1, :, :]    # fresh f32 load for the residual
    o_ref[...] = jnp.maximum(h3.reshape(TH, W, Cout) + identity, 0.0)


def fold_bn_into_conv(w, gamma, beta, mean, var, eps=1e-5):
    """Fold BN (inference) into a conv whose OUTPUT channel is the last axis of w."""
    scale = gamma / jnp.sqrt(var + eps)
    bias = beta - mean * scale
    return w * scale, bias.reshape(1, -1)


def bottleneck_pallas(x_nchw, params, *, tile_h=8):
    """x_nchw: (N, C, H, W) float32.  Returns (N, C, H, W) float32."""
    x = jnp.transpose(x_nchw, (0, 2, 3, 1)).astype(jnp.float32)   # NCHW -> NHWC
    N, H, W, Cin = x.shape

    w1, b1 = fold_bn_into_conv(params["w1"], *params["bn1"])
    w2, b2 = fold_bn_into_conv(params["w2"], *params["bn2"])
    w3, b3 = fold_bn_into_conv(params["w3"], *params["bn3"])
    width = w1.shape[1]
    Cout = w3.shape[1]

    assert Cin == Cout, "residual path requires inplanes == planes*4 (downsample=None)"
    th = min(tile_h, H)
    assert H % th == 0, "H must be divisible by the H-tile size"
    nt = H // th

    w1b = w1.astype(jnp.bfloat16)                                  # (Cin, width)
    w2b = w2.reshape(9 * width, width).astype(jnp.bfloat16)        # (9*width, width)
    w3b = w3.astype(jnp.bfloat16)                                  # (width, Cout)

    # Overlapping H windows (+1 halo row on each side, zero-padded at the image
    # border) built once on the XLA side so each tile's 3x3 conv sees the true
    # conv1 output of its neighbours.  xwin: (N, nt, th+2, W, Cin).
    xp = jnp.pad(x, ((0, 0), (1, 1), (0, 0), (0, 0)))
    xwin = jnp.stack([xp[:, t * th:t * th + th + 2] for t in range(nt)], axis=1)

    out = pl.pallas_call(
        bottleneck_kernel,
        out_shape=jax.ShapeDtypeStruct((N, H, W, Cout), jnp.float32),
        grid=(N, nt),
        in_specs=[
            pl.BlockSpec((None, None, th + 2, W, Cin),
                         lambda n, t: (n, t, 0, 0, 0)),            # x window tile
            pl.BlockSpec((Cin, width), lambda n, t: (0, 0)),       # w1 (bf16)
            pl.BlockSpec((9 * width, width), lambda n, t: (0, 0)), # w2 im2col (bf16)
            pl.BlockSpec((width, Cout), lambda n, t: (0, 0)),      # w3 (bf16)
            pl.BlockSpec((1, width), lambda n, t: (0, 0)),         # bn1 bias (f32)
            pl.BlockSpec((1, width), lambda n, t: (0, 0)),         # bn2 bias (f32)
            pl.BlockSpec((1, Cout), lambda n, t: (0, 0)),          # bn3 bias (f32)
        ],
        out_specs=pl.BlockSpec((None, th, W, Cout), lambda n, t: (n, t, 0, 0)),
        scratch_shapes=[pltpu.VMEM((th + 2, W + 2, width), jnp.float32)],
        compiler_params=pltpu.CompilerParams(
            dimension_semantics=("parallel", "parallel"),
            vmem_limit_bytes=32 * 1024 * 1024),
    )(xwin, w1b, w2b, w3b, b1, b2, b3)
    return jnp.transpose(out, (0, 3, 1, 2))                        # NHWC -> NCHW


def reference_bottleneck(x_nchw, params):
    """Pure-JAX reference with the same folded weights and the same bf16-matmul /
    f32-accumulation precision choice as the kernel."""
    x = jnp.transpose(x_nchw, (0, 2, 3, 1)).astype(jnp.float32)
    dn = ("NHWC", "HWIO", "NHWC")
    w1, b1 = fold_bn_into_conv(params["w1"], *params["bn1"])
    w2, b2 = fold_bn_into_conv(params["w2"], *params["bn2"])
    w3, b3 = fold_bn_into_conv(params["w3"], *params["bn3"])

    def conv(h, w, pad):
        return lax.conv_general_dilated(
            h.astype(jnp.bfloat16), w.astype(jnp.bfloat16), (1, 1), pad,
            dimension_numbers=dn, preferred_element_type=jnp.float32)

    h = jnp.maximum(conv(x, w1[None, None], "VALID") + b1, 0.0)
    h = jnp.maximum(conv(h, w2, [(1, 1), (1, 1)]) + b2, 0.0)
    h = conv(h, w3[None, None], "VALID") + b3
    out = jnp.maximum(h + x, 0.0)
    return jnp.transpose(out, (0, 3, 1, 2))


def init_params(key, inplanes, planes, base_width=64, groups=1):
    width = int(planes * (base_width / 64.0)) * groups
    cout = planes * 4                                              # expansion = 4
    ks = jax.random.split(key, 6)

    def bn_params(k, c):
        k1, k2, k3, k4 = jax.random.split(k, 4)
        gamma = 1.0 + 0.1 * jax.random.normal(k1, (c,), jnp.float32)
        beta = 0.1 * jax.random.normal(k2, (c,), jnp.float32)
        mean = 0.1 * jax.random.normal(k3, (c,), jnp.float32)
        var = 1.0 + 0.1 * jax.random.uniform(k4, (c,), jnp.float32)
        return (gamma, beta, mean, var)

    return {
        # conv weights stored channels-last: (Cin, Cout) / HWIO (transposed from OIHW)
        "w1": 0.1 * jax.random.normal(ks[0], (inplanes, width), jnp.float32),
        "w2": 0.1 * jax.random.normal(ks[1], (3, 3, width, width), jnp.float32),
        "w3": 0.1 * jax.random.normal(ks[2], (width, cout), jnp.float32),
        "bn1": bn_params(ks[3], width),
        "bn2": bn_params(ks[4], width),
        "bn3": bn_params(ks[5], cout),
    }


if __name__ == "__main__":
    key = jax.random.PRNGKey(0)
    k_x, k_p = jax.random.split(key)

    # Bottleneck(inplanes=512, planes=128): width=128, out channels=512, stride=1.
    # Channel counts deliberately lane-dense (multiples of 128) per the perf review;
    # total tensor sizes stay small (x is 1 MiB).
    N, inplanes, planes, H, W = 2, 512, 128, 16, 16
    x = jax.random.normal(k_x, (N, inplanes, H, W), jnp.float32)
    params = init_params(k_p, inplanes, planes)

    out = jax.jit(bottleneck_pallas)(x, params)
    out = jax.block_until_ready(out)

    ref = reference_bottleneck(x, params)
    assert out.shape == (N, planes * 4, H, W)
    assert bool(jnp.allclose(out, ref, atol=1e-2, rtol=1e-2)), "mismatch vs reference"
    print("KERNEL_OK")
</pallas_src>

<mosaic_0001>
module attributes {stable_mosaic.version = 11 : i64} {
  func.func @bottleneck_kernel(%arg0: i32, %arg1: i32, %arg2: memref<1x1x10x16x512xf32, #tpu.memory_space<vmem>>, %arg3: memref<512x128xbf16, #tpu.memory_space<vmem>>, %arg4: memref<1152x128xbf16, #tpu.memory_space<vmem>>, %arg5: memref<128x512xbf16, #tpu.memory_space<vmem>>, %arg6: memref<1x128xf32, #tpu.memory_space<vmem>>, %arg7: memref<1x128xf32, #tpu.memory_space<vmem>>, %arg8: memref<1x512xf32, #tpu.memory_space<vmem>>, %arg9: memref<1x8x16x512xf32, #tpu.memory_space<vmem>>, %arg10: memref<10x18x128xf32, #tpu.memory_space<vmem>>) attributes {dimension_semantics = [#tpu.dimension_semantics<parallel>, #tpu.dimension_semantics<parallel>], iteration_bounds = array<i64: 2, 2>, scalar_prefetch = 0 : i64, scratch_operands = 1 : i64, tpu.core_type = #tpu.core_type<tc>, window_params = [{transform_indices = @transform_0, window_bounds = array<i64: 1, 1, 10, 16, 512>}, {pipeline_mode = #tpu.pipeline_mode<synchronous>, transform_indices = @transform_1, window_bounds = array<i64: 512, 128>}, {pipeline_mode = #tpu.pipeline_mode<synchronous>, transform_indices = @transform_2, window_bounds = array<i64: 1152, 128>}, {pipeline_mode = #tpu.pipeline_mode<synchronous>, transform_indices = @transform_3, window_bounds = array<i64: 128, 512>}, {pipeline_mode = #tpu.pipeline_mode<synchronous>, transform_indices = @transform_4, window_bounds = array<i64: 1, 128>}, {pipeline_mode = #tpu.pipeline_mode<synchronous>, transform_indices = @transform_5, window_bounds = array<i64: 1, 128>}, {pipeline_mode = #tpu.pipeline_mode<synchronous>, transform_indices = @transform_6, window_bounds = array<i64: 1, 512>}, {transform_indices = @transform_7, window_bounds = array<i64: 1, 8, 16, 512>}]} {
    %c0 = arith.constant 0 : index
    %c0_0 = arith.constant 0 : index
    %c0_1 = arith.constant 0 : index
    %c0_2 = arith.constant 0 : index
    %c0_3 = arith.constant 0 : index
    %0 = vector.load %arg2[%c0, %c0_0, %c0_1, %c0_2, %c0_3] : memref<1x1x10x16x512xf32, #tpu.memory_space<vmem>>, vector<1x1x10x16x512xf32>
    %1 = vector.shape_cast %0 : vector<1x1x10x16x512xf32> to vector<10x16x512xf32>
    %2 = vector.shape_cast %1 : vector<10x16x512xf32> to vector<160x512xf32>
    %3 = arith.truncf %2 : vector<160x512xf32> to vector<160x512xbf16>
    %c0_4 = arith.constant 0 : index
    %c0_5 = arith.constant 0 : index
    %4 = vector.load %arg3[%c0_4, %c0_5] : memref<512x128xbf16, #tpu.memory_space<vmem>>, vector<512x128xbf16>
    %cst = arith.constant dense<0.000000e+00> : vector<160x128xf32>
    %5 = tpu.matmul %3, %4, %cst {dimension_numbers = #tpu.dot_dimension_numbers<[1], [0], [0], [1], [0, 0, 1, 1], [], []>} : vector<160x512xbf16>, vector<512x128xbf16>, vector<160x128xf32> -> vector<160x128xf32>
    %c0_6 = arith.constant 0 : index
    %c0_7 = arith.constant 0 : index
    %6 = vector.load %arg6[%c0_6, %c0_7] : memref<1x128xf32, #tpu.memory_space<vmem>>, vector<1x128xf32>
    %7 = vector.broadcast %6 : vector<1x128xf32> to vector<160x128xf32>
    %8 = arith.addf %5, %7 : vector<160x128xf32>
    %cst_8 = arith.constant 0.000000e+00 : f32
    %9 = vector.broadcast %cst_8 : f32 to vector<160x128xf32>
    %10 = arith.maximumf %8, %9 : vector<160x128xf32>
    %11 = vector.shape_cast %10 : vector<160x128xf32> to vector<10x16x128xf32>
    %12 = tpu.iota {dimensions = array<i32: 0>} : vector<10x16x128xi32>
    %c8_i32 = arith.constant 8 : i32
    %13 = arith.muli %arg1, %c8_i32 : i32
    %c1_i32 = arith.constant 1 : i32
    %14 = arith.subi %13, %c1_i32 : i32
    %15 = vector.broadcast %14 : i32 to vector<10x16x128xi32>
    %16 = arith.addi %15, %12 : vector<10x16x128xi32>
    %c0_i32 = arith.constant 0 : i32
    %17 = vector.broadcast %c0_i32 : i32 to vector<10x16x128xi32>
    %18 = arith.cmpi sge, %16, %17 : vector<10x16x128xi32>
    %c16_i32 = arith.constant 16 : i32
    %19 = vector.broadcast %c16_i32 : i32 to vector<10x16x128xi32>
    %20 = arith.cmpi slt, %16, %19 : vector<10x16x128xi32>
    %21 = arith.andi %18, %20 : vector<10x16x128xi1>
    %cst_9 = arith.constant 0.000000e+00 : f32
    %22 = vector.broadcast %cst_9 : f32 to vector<10x16x128xf32>
    %23 = arith.select %21, %11, %22 : vector<10x16x128xi1>, vector<10x16x128xf32>
    %cst_10 = arith.constant 0.000000e+00 : f32
    %24 = vector.broadcast %cst_10 : f32 to vector<10x1x128xf32>
    %c0_11 = arith.constant 0 : index
    %c0_12 = arith.constant 0 : index
    %c0_13 = arith.constant 0 : index
    %25 = vector.load %arg10[%c0_11, %c0_12, %c0_13] : memref<10x18x128xf32, #tpu.memory_space<vmem>>, vector<10x1x128xf32>
    tpu.vector_store %arg10[%c0_11, %c0_12, %c0_13], %24 {strides = array<i32>} : memref<10x18x128xf32, #tpu.memory_space<vmem>>, vector<10x1x128xf32>,
    %c0_14 = arith.constant 0 : index
    %c17 = arith.constant 17 : index
    %c0_15 = arith.constant 0 : index
    %26 = vector.load %arg10[%c0_14, %c17, %c0_15] : memref<10x18x128xf32, #tpu.memory_space<vmem>>, vector<10x1x128xf32>
    tpu.vector_store %arg10[%c0_14, %c17, %c0_15], %24 {strides = array<i32>} : memref<10x18x128xf32, #tpu.memory_space<vmem>>, vector<10x1x128xf32>,
    %c0_16 = arith.constant 0 : index
    %c1 = arith.constant 1 : index
    %c0_17 = arith.constant 0 : index
    %27 = vector.load %arg10[%c0_16, %c1, %c0_17] : memref<10x18x128xf32, #tpu.memory_space<vmem>>, vector<10x16x128xf32>
    tpu.vector_store %arg10[%c0_16, %c1, %c0_17], %23 {strides = array<i32>} : memref<10x18x128xf32, #tpu.memory_space<vmem>>, vector<10x16x128xf32>,
    %c0_18 = arith.constant 0 : index
    %c0_19 = arith.constant 0 : index
    %c0_20 = arith.constant 0 : index
    %28 = vector.load %arg10[%c0_18, %c0_19, %c0_20] : memref<10x18x128xf32, #tpu.memory_space<vmem>>, vector<8x16x128xf32>
    %c0_21 = arith.constant 0 : index
    %c1_22 = arith.constant 1 : index
    %c0_23 = arith.constant 0 : index
    %29 = vector.load %arg10[%c0_21, %c1_22, %c0_23] : memref<10x18x128xf32, #tpu.memory_space<vmem>>, vector<8x16x128xf32>
    %c0_24 = arith.constant 0 : index
    %c2 = arith.constant 2 : index
    %c0_25 = arith.constant 0 : index
    %30 = vector.load %arg10[%c0_24, %c2, %c0_25] : memref<10x18x128xf32, #tpu.memory_space<vmem>>, vector<8x16x128xf32>
    %c1_26 = arith.constant 1 : index
    %c0_27 = arith.constant 0 : index
    %c0_28 = arith.constant 0 : index
    %31 = vector.load %arg10[%c1_26, %c0_27, %c0_28] : memref<10x18x128xf32, #tpu.memory_space<vmem>>, vector<8x16x128xf32>
    %c1_29 = arith.constant 1 : index
    %c1_30 = arith.constant 1 : index
    %c0_31 = arith.constant 0 : index
    %32 = vector.load %arg10[%c1_29, %c1_30, %c0_31] : memref<10x18x128xf32, #tpu.memory_space<vmem>>, vector<8x16x128xf32>
    %c1_32 = arith.constant 1 : index
    %c2_33 = arith.constant 2 : index
    %c0_34 = arith.constant 0 : index
    %33 = vector.load %arg10[%c1_32, %c2_33, %c0_34] : memref<10x18x128xf32, #tpu.memory_space<vmem>>, vector<8x16x128xf32>
    %c2_35 = arith.constant 2 : index
    %c0_36 = arith.constant 0 : index
    %c0_37 = arith.constant 0 : index
    %34 = vector.load %arg10[%c2_35, %c0_36, %c0_37] : memref<10x18x128xf32, #tpu.memory_space<vmem>>, vector<8x16x128xf32>
    %c2_38 = arith.constant 2 : index
    %c1_39 = arith.constant 1 : index
    %c0_40 = arith.constant 0 : index
    %35 = vector.load %arg10[%c2_38, %c1_39, %c0_40] : memref<10x18x128xf32, #tpu.memory_space<vmem>>, vector<8x16x128xf32>
    %c2_41 = arith.constant 2 : index
    %c2_42 = arith.constant 2 : index
    %c0_43 = arith.constant 0 : index
    %36 = vector.load %arg10[%c2_41, %c2_42, %c0_43] : memref<10x18x128xf32, #tpu.memory_space<vmem>>, vector<8x16x128xf32>
    %37 = tpu.concatenate %28, %29, %30, %31, %32, %33, %34, %35, %36 in 2 : vector<8x16x128xf32>, vector<8x16x128xf32>, vector<8x16x128xf32>, vector<8x16x128xf32>, vector<8x16x128xf32>, vector<8x16x128xf32>, vector<8x16x128xf32>, vector<8x16x128xf32>, vector<8x16x128xf32> -> vector<8x16x1152xf32>
    %38 = vector.shape_cast %37 : vector<8x16x1152xf32> to vector<128x1152xf32>
    %39 = arith.truncf %38 : vector<128x1152xf32> to vector<128x1152xbf16>
    %c0_44 = arith.constant 0 : index
    %c0_45 = arith.constant 0 : index
    %40 = vector.load %arg4[%c0_44, %c0_45] : memref<1152x128xbf16, #tpu.memory_space<vmem>>, vector<1152x128xbf16>
    %cst_46 = arith.constant dense<0.000000e+00> : vector<128x128xf32>
    %41 = tpu.matmul %39, %40, %cst_46 {dimension_numbers = #tpu.dot_dimension_numbers<[1], [0], [0], [1], [0, 0, 1, 1], [], []>} : vector<128x1152xbf16>, vector<1152x128xbf16>, vector<128x128xf32> -> vector<128x128xf32>
    %c0_47 = arith.constant 0 : index
    %c0_48 = arith.constant 0 : index
    %42 = vector.load %arg7[%c0_47, %c0_48] : memref<1x128xf32, #tpu.memory_space<vmem>>, vector<1x128xf32>
    %43 = vector.broadcast %42 : vector<1x128xf32> to vector<128x128xf32>
    %44 = arith.addf %41, %43 : vector<128x128xf32>
    %cst_49 = arith.constant 0.000000e+00 : f32
    %45 = vector.broadcast %cst_49 : f32 to vector<128x128xf32>
    %46 = arith.maximumf %44, %45 : vector<128x128xf32>
    %47 = arith.truncf %46 : vector<128x128xf32> to vector<128x128xbf16>
    %c0_50 = arith.constant 0 : index
    %c0_51 = arith.constant 0 : index
    %48 = vector.load %arg5[%c0_50, %c0_51] : memref<128x512xbf16, #tpu.memory_space<vmem>>, vector<128x512xbf16>
    %cst_52 = arith.constant dense<0.000000e+00> : vector<128x512xf32>
    %49 = tpu.matmul %47, %48, %cst_52 {dimension_numbers = #tpu.dot_dimension_numbers<[1], [0], [0], [1], [0, 0, 1, 1], [], []>} : vector<128x128xbf16>, vector<128x512xbf16>, vector<128x512xf32> -> vector<128x512xf32>
    %c0_53 = arith.constant 0 : index
    %c0_54 = arith.constant 0 : index
    %50 = vector.load %arg8[%c0_53, %c0_54] : memref<1x512xf32, #tpu.memory_space<vmem>>, vector<1x512xf32>
    %51 = vector.broadcast %50 : vector<1x512xf32> to vector<128x512xf32>
    %52 = arith.addf %49, %51 : vector<128x512xf32>
    %c0_55 = arith.constant 0 : index
    %c0_56 = arith.constant 0 : index
    %c1_57 = arith.constant 1 : index
    %c0_58 = arith.constant 0 : index
    %c0_59 = arith.constant 0 : index
    %53 = vector.load %arg2[%c0_55, %c0_56, %c1_57, %c0_58, %c0_59] : memref<1x1x10x16x512xf32, #tpu.memory_space<vmem>>, vector<1x1x8x16x512xf32>
    %54 = vector.shape_cast %53 : vector<1x1x8x16x512xf32> to vector<8x16x512xf32>
    %55 = vector.shape_cast %52 : vector<128x512xf32> to vector<8x16x512xf32>
    %56 = arith.addf %55, %54 : vector<8x16x512xf32>
    %cst_60 = arith.constant 0.000000e+00 : f32
    %57 = vector.broadcast %cst_60 : f32 to vector<8x16x512xf32>
    %58 = arith.maximumf %56, %57 : vector<8x16x512xf32>
    %c0_61 = arith.constant 0 : index
    %c0_62 = arith.constant 0 : index
    %c0_63 = arith.constant 0 : index
    %c0_64 = arith.constant 0 : index
    %59 = vector.load %arg9[%c0_61, %c0_62, %c0_63, %c0_64] : memref<1x8x16x512xf32, #tpu.memory_space<vmem>>, vector<1x8x16x512xf32>
    %60 = vector.shape_cast %59 : vector<1x8x16x512xf32> to vector<8x16x512xf32>
    %61 = vector.shape_cast %58 : vector<8x16x512xf32> to vector<1x8x16x512xf32>
    tpu.vector_store %arg9[%c0_61, %c0_62, %c0_63, %c0_64], %61 {strides = array<i32>} : memref<1x8x16x512xf32, #tpu.memory_space<vmem>>, vector<1x8x16x512xf32>,
    return
  }
  func.func @transform_0(%arg0: i32, %arg1: i32) -> (i32, i32, i32, i32, i32) {
    %c0_i32 = arith.constant 0 : i32
    %c0_i32_0 = arith.constant 0 : i32
    %c0_i32_1 = arith.constant 0 : i32
    %c0_i32_2 = arith.constant 0 : i32
    return %arg0, %arg1, %c0_i32, %c0_i32_0, %c0_i32_1 : i32, i32, i32, i32, i32
  }
  func.func @transform_1(%arg0: i32, %arg1: i32) -> (i32, i32) {
    %c0_i32 = arith.constant 0 : i32
    %c0_i32_0 = arith.constant 0 : i32
    %c0_i32_1 = arith.constant 0 : i32
    return %c0_i32, %c0_i32_0 : i32, i32
  }
  func.func @transform_2(%arg0: i32, %arg1: i32) -> (i32, i32) {
    %c0_i32 = arith.constant 0 : i32
    %c0_i32_0 = arith.constant 0 : i32
    %c0_i32_1 = arith.constant 0 : i32
    return %c0_i32, %c0_i32_0 : i32, i32
  }
  func.func @transform_3(%arg0: i32, %arg1: i32) -> (i32, i32) {
    %c0_i32 = arith.constant 0 : i32
    %c0_i32_0 = arith.constant 0 : i32
    %c0_i32_1 = arith.constant 0 : i32
    return %c0_i32, %c0_i32_0 : i32, i32
  }
  func.func @transform_4(%arg0: i32, %arg1: i32) -> (i32, i32) {
    %c0_i32 = arith.constant 0 : i32
    %c0_i32_0 = arith.constant 0 : i32
    %c0_i32_1 = arith.constant 0 : i32
    return %c0_i32, %c0_i32_0 : i32, i32
  }
  func.func @transform_5(%arg0: i32, %arg1: i32) -> (i32, i32) {
    %c0_i32 = arith.constant 0 : i32
    %c0_i32_0 = arith.constant 0 : i32
    %c0_i32_1 = arith.constant 0 : i32
    return %c0_i32, %c0_i32_0 : i32, i32
  }
  func.func @transform_6(%arg0: i32, %arg1: i32) -> (i32, i32) {
    %c0_i32 = arith.constant 0 : i32
    %c0_i32_0 = arith.constant 0 : i32
    %c0_i32_1 = arith.constant 0 : i32
    return %c0_i32, %c0_i32_0 : i32, i32
  }
  func.func @transform_7(%arg0: i32, %arg1: i32) -> (i32, i32, i32, i32) {
    %c0_i32 = arith.constant 0 : i32
    %c0_i32_0 = arith.constant 0 : i32
    %c0_i32_1 = arith.constant 0 : i32
    return %arg0, %arg1, %c0_i32, %c0_i32_0 : i32, i32, i32, i32
  }
}

</mosaic_0001>

<bundles_post_ra>
// kernel: bottleneck_pallas.1
= control target key start
LH: loop header
LB: loop body
LE: loop exit
PB: predicated region body
PF: predicated region fallthrough
CT: control target
= control target key end

     0   :  { %12 = vsyncpa [#allocation4], 0  ;;  %s5678_s0 = inlined_call_operand.vmem [shape: f32[2,2,10,16,512], index: 0, kind: input, shape index: {}]   ;;  %s5679_s1 = inlined_call_operand.vmem [shape: bf16[512,128], index: 1, kind: input, shape index: {}]   ;;  %s5680_s2 = inlined_call_operand.vmem [shape: bf16[1152,128], index: 2, kind: input, shape index: {}]   ;;  %s5681_s3 = inlined_call_operand.vmem [shape: bf16[128,512], index: 3, kind: input, shape index: {}]   ;;  %s5682_s4 = inlined_call_operand.vmem [shape: f32[1,128], index: 4, kind: input, shape index: {}]   ;;  %s5683_s5 = inlined_call_operand.vmem [shape: f32[1,128], index: 5, kind: input, shape index: {}]   ;;  %s5684_s6 = inlined_call_operand.vmem [shape: f32[1,512], index: 6, kind: input, shape index: {}]   ;;  %s5685_s7 = inlined_call_operand.hbm [shape: f32[2,16,16,512], index: 7, kind: output, shape index: {}]  }
   0x1   :  { %14 = vsyncpa [#allocation4 + $0x1], 0  ;;  %s4281_s24 = smov 0   ;;  %s4283_s25 = smov 0  }
   0x2   :  { %s4285_s26 = smov 0   ;;  %s4287_s27 = smov 0  }
   0x3   :  { %s4289_s28 = smov 0   ;;  %s4291_s29 = smov 0  }
   0x4   :  { %s4293_s30 = smov 0   ;;  %s4295_s8 = smov 0  }
   0x5 LB: > { %s3147_s9 = sadd.s32 4294967295, %s4233_s8   ;;  %s3148_s10 = sadd.s32 4294967294, %s4233_s8   ;;  %s4233_s8 = sphi %s4295_s8, %s20_s8   ;;  %s4229_s30 = sphi %s4293_s30, %s5732_s30   ;;  %s4225_s29 = sphi %s4291_s29, %s5731_s29   ;;  %s4221_s28 = sphi %s4289_s28, %s5730_s28   ;;  %s4217_s27 = sphi %s4287_s27, %s5729_s27   ;;  %s4213_s26 = sphi %s4285_s26, %s5728_s26   ;;  %s4209_s25 = sphi %s4283_s25, %s5727_s25   ;;  %s4205_s24 = sphi %s4281_s24, %s5726_s24  }
   0x6   : > { %s29_s11 = sadd.s32 1, %s4225_s29  ;;  %s32_s12 = sadd.s32 1, %s4229_s30 }
   0x7   : > { %p30_p0 = scmp.ge.s32.totalorder %s29_s11, 2  ;;  %p205_p1 = scmp.ne.s32.totalorder %s4213_s26, %s4209_s25 }
   0x8   : > { %p206_p2 = scmp.eq.s32.totalorder %s3147_s9, 3  ;;  %p211_p5 = scmp.ne.s32.totalorder %s4209_s25, %s4205_s24 }
   0x9   : > { %s5734_s11 = smov (%p30_p0, %s29_s11), 0  ;;  %s5736_s12 = smov (!%p30_p0, %s32_s12), %s4229_s30 }
   0xa   : > { %5688 = sst [smem:[#allocation6_spill]] %s5734_s11  ;;  %s191_s13 = ssub.s32 %s4225_s29, %s5734_s11 }
   0xb   : > { %p4332_p3 = por %p206_p2, %p205_p1  ;;  %p34_p4 = scmp.ge.s32.totalorder %s5736_s12, 2 }
   0xc   : > { %p212_p6 = scmp.eq.s32.totalorder %s3148_s10, 3  ;;  %p3151_p7 = scmp.ge.s32.totalorder %s4233_s8, 1 }
   0xd   : > { %s5738_s12 = smov (%p34_p4, %s5736_s12), 0  ;;  %p260_p9 = scmp.lt.s32.totalorder %s4233_s8, 5 }
   0xe   : > { %5690 = sst [smem:[#allocation7_spill]] %s5738_s12  ;;  %p4341_p8 = por %p212_p6, %p211_p5 }
   0xf   : > { %s190_s16 = ssub.s32 %s4229_s30, %s5738_s12  ;;  %s195_s17 = sadd.s32 1, %s4213_s26 }
  0x10   : > { %s192_s18 = sor.u32 %s191_s13, %s190_s16  ;;  %p261_p10 = pnand %p3151_p7, %p260_p9 }
  0x11   : > { %p193_p11 = scmp.eq.s32.totalorder %s192_s18, 0  ;;  %v3915_v0 = vld [vmem:[%s5679_s1 + $0x40] sm:$0xff] (!%p261_p10)   ;;  %v3919_v4 = vld [vmem:[%s5679_s1 + $0x48] sm:$0xff] (!%p261_p10)   ;;  %v3923_v8 = vld [vmem:[%s5679_s1 + $0x50] sm:$0xff] (!%p261_p10)   ;;  %p296_p12 = scmp.lt.s32.totalorder (!%p261_p10), %s4221_s28, 1 }
  0x12   : > { %264 = sbr.rel (%p261_p10) target bundleno = 943 (0x3af), region = 48  ;;  %v3916_v1 = vld [vmem:[%s5679_s1 + $0xc0] sm:$0xff] (!%p261_p10)   ;;  %3366 = vmatprep.subr.bf16.mxu0 (!%p261_p10), %v3915_v0  ;;  %v3920_v5 = vld [vmem:[%s5679_s1 + $0xc8] sm:$0xff] (!%p261_p10)   ;;  %v3924_v9 = vld [vmem:[%s5679_s1 + $0xd0] sm:$0xff] (!%p261_p10)   ;;  %p298_p13 = scmp.lt.s32.totalorder (!%p261_p10), %s4217_s27, 1 }
  0x13   : > { %s4350_s19 = scalar_select %p193_p11, %s4213_s26, %s195_s17  }
  0x14   : > { %v3917_v2 = vld [vmem:[%s5679_s1] sm:$0xff] (!%p261_p10)   ;;  %3442 = vmatprep.subr.bf16.mxu1 (!%p261_p10), %v3916_v1  ;;  %v3921_v6 = vld [vmem:[%s5679_s1 + $0x8] sm:$0xff] (!%p261_p10)   ;;  %v3925_v10 = vld [vmem:[%s5679_s1 + $0x10] sm:$0xff] (!%p261_p10)   ;;  %s3365_s21 = sshll.u32 (!%p261_p10), %s4217_s27, 6  ;;  %s4238_s13 = smov (!%p261_p10), [#allocation3]  }
  0x15   : > { %v3918_v3 = vld [vmem:[%s5679_s1 + $0x80] sm:$0xff] (!%p261_p10)   ;;  %3367 = vmatpush3.bf16.msra.mxu0 (!%p261_p10), %v3917_v2  ;;  %v3922_v7 = vld [vmem:[%s5679_s1 + $0x88] sm:$0xff] (!%p261_p10)   ;;  %v3926_v11 = vld [vmem:[%s5679_s1 + $0x90] sm:$0xff] (!%p261_p10)  }
  0x16   : > { %3443 = vmatpush3.bf16.msra.mxu1 (!%p261_p10), %v3918_v3  ;;  %3368 = vmatprep.subr.bf16.mxu0 (!%p261_p10), %v3919_v4  ;;  %v3927_v12 = vld [vmem:[%s5679_s1 + $0x58] sm:$0xff] (!%p261_p10)   ;;  %v3931_v16 = vld [vmem:[%s5679_s1 + $0x60] sm:$0xff] (!%p261_p10)   ;;  %v3935_v20 = vld [vmem:[%s5679_s1 + $0x68] sm:$0xff] (!%p261_p10)  }
  0x17   : > { %3444 = vmatprep.subr.bf16.mxu1 (!%p261_p10), %v3920_v5  ;;  %v3928_v13 = vld [vmem:[%s5679_s1 + $0xd8] sm:$0xff] (!%p261_p10)   ;;  %v3932_v17 = vld [vmem:[%s5679_s1 + $0xe0] sm:$0xff] (!%p261_p10)   ;;  %v3936_v21 = vld [vmem:[%s5679_s1 + $0xe8] sm:$0xff] (!%p261_p10)  }
  0x18   : > { %v3929_v14 = vld [vmem:[%s5679_s1 + $0x18] sm:$0xff] (!%p261_p10)   ;;  %v3933_v18 = vld [vmem:[%s5679_s1 + $0x20] sm:$0xff] (!%p261_p10)   ;;  %v3937_v22 = vld [vmem:[%s5679_s1 + $0x28] sm:$0xff] (!%p261_p10)  }
  0x19   : > { %3369 = vmatpush3.bf16.msra.mxu0 %v3921_v6  ;;  %s297_s20 = scalar_select %p296_p12, %s4221_s28, 1  ;;  %v3930_v15 = vld [vmem:[%s5679_s1 + $0x98] sm:$0xff]   ;;  %v3934_v19 = vld [vmem:[%s5679_s1 + $0xa0] sm:$0xff]   ;;  %v3938_v23 = vld [vmem:[%s5679_s1 + $0xa8] sm:$0xff]  }
  0x1a   : > { %3445 = vmatpush3.bf16.msra.mxu1 %v3922_v7  ;;  %3370 = vmatprep.subr.bf16.mxu0 %v3923_v8  ;;  %s299_s23 = scalar_select %p298_p13, %s4217_s27, 1  ;;  %v3939_v24 = vld [vmem:[%s5679_s1 + $0x70] sm:$0xff]   ;;  %v3943_v28 = vld [vmem:[%s5679_s1 + $0x78] sm:$0xff]  }
  0x1b   : > { %3446 = vmatprep.subr.bf16.mxu1 %v3924_v9  ;;  %s3839_s12 = smul.u32 160, %s297_s20  ;;  %v3940_v25 = vld [vmem:[%s5679_s1 + $0xf0] sm:$0xff]   ;;  %v3944_v29 = vld [vmem:[%s5679_s1 + $0xf8] sm:$0xff]  }
  0x1c   : > { %s3838_s11 = smul.u32 80, %s299_s23  ;;  %v3941_v26 = vld [vmem:[%s5679_s1 + $0x30] sm:$0xff]   ;;  %v3945_v30 = vld [vmem:[%s5679_s1 + $0x38] sm:$0xff]  }
  0x1d   : > { %3371 = vmatpush3.bf16.msra.mxu0 %v3925_v10  ;;  %v3942_v27 = vld [vmem:[%s5679_s1 + $0xb0] sm:$0xff]   ;;  %v3946_v31 = vld [vmem:[%s5679_s1 + $0xb8] sm:$0xff]  }
  0x1e   : > { %3447 = vmatpush3.bf16.msra.mxu1 %v3926_v11  ;;  %3372 = vmatprep.subr.bf16.mxu0 %v3927_v12  ;;  %s302_s23 = sadd.s32 %s3839_s12, %s3838_s11  ;;  %s3187_s12 = sshll.u32 %s4217_s27, 3 }
  0x1f   : > { %3448 = vmatprep.subr.bf16.mxu1 %v3928_v13  ;;  %s3153_s18 = sshll.u32 %s302_s23, 3  ;;  %s3188_s22 = sadd.s32 4294967295, %s3187_s12 }
  0x20   : > { %s4449_s16 = scalar_lea.vmem %s5678_s0, %s3153_s18  ;;  %s293_s23 = sand.u32 1, %s4209_s25  }
  0x21   : > { %3373 = vmatpush3.bf16.msra.mxu0 %v3929_v14  ;;  %v308_v32 = vld [vmem:[%s4449_s16 + $0x8] sm:$0xff]  ;;  %v310_v34 = vld [vmem:[%s4449_s16 + $0x18] sm:$0xff]  ;;  %v307_v37 = vld [vmem:[%s4449_s16] sm:$0xff]  ;;  %s5419_s17 = sshll.u32 %s293_s23, 9  ;;  %s3361_s18 = sshll.u32 %s4221_s28, 7 }
  0x22   : > { %3449 = vmatpush3.bf16.msra.mxu1 %v3930_v15  ;;  %3374 = vmatprep.subr.bf16.mxu0 %v3931_v16  ;;  %v312_v33 = vld [vmem:[%s4449_s16 + $0x28] sm:$0xff]  ;;  %v314_v36 = vld [vmem:[%s4449_s16 + $0x38] sm:$0xff]  ;;  %v311_v38 = vld [vmem:[%s4449_s16 + $0x20] sm:$0xff]  ;;  %s5436_s20 = scalar_lea.vmem [#allocation3], %s5419_s17  ;;  %s3059_s11 = sadd.s32 %s3365_s21, %s3361_s18 }
  0x23   : > { %3450 = vmatprep.subr.bf16.mxu1 %v3932_v17  ;;  %v388_v35 = vpack.c.bf16 %v312_v33, %v308_v32  ;;  %v390_v39 = vpack.c.bf16 %v314_v36, %v310_v34  ;;  %v387_v40 = vpack.c.bf16 %v311_v38, %v307_v37  ;;  %v309_v41 = vld [vmem:[%s4449_s16 + $0x10] sm:$0xff]  ;;  %v316_v43 = vld [vmem:[%s4449_s16 + $0x48] sm:$0xff]  ;;  %v318_v46 = vld [vmem:[%s4449_s16 + $0x58] sm:$0xff]  ;;  %s3362_s27 = sshll.u32 %s3059_s11, 7  ;;  %s3062_s28 = sshll.u32 %s5436_s20, 4  ;;  %s5619_s28 = int_to_ptr.vmem [resolvable:$true] %s3062_s28 }
  0x24   : > { %v313_v42 = vld [vmem:[%s4449_s16 + $0x30] sm:$0xff]  ;;  %v320_v45 = vld [vmem:[%s4449_s16 + $0x68] sm:$0xff]  ;;  %v322_v47 = vld [vmem:[%s4449_s16 + $0x78] sm:$0xff]  ;;  %s5617_s9 = scalar_lea.hbm %s5685_s7, %s3362_s27  ;;  %s4139_s10 = scalar_lea.vmem %s5619_s28, 8192 }
  0x25   : > { %3375 = vmatpush3.bf16.msra.mxu0 %v3933_v18  ;;  %722 = vmatprep.mubr.bf16.mxu0 %v388_v35  ;;  %v389_v44 = vpack.c.bf16 %v313_v42, %v309_v41  ;;  %v392_v48 = vpack.c.bf16 %v320_v45, %v316_v43  ;;  %v394_v49 = vpack.c.bf16 %v322_v47, %v318_v46  ;;  %v315_v50 = vld [vmem:[%s4449_s16 + $0x40] sm:$0xff]  ;;  %v317_v52 = vld [vmem:[%s4449_s16 + $0x50] sm:$0xff]  ;;  %v324_v54 = vld [vmem:[%s4449_s16 + $0x88] sm:$0xff]  ;;  %p4140_p0 = scmp.ne.s32.totalorder %s5619_s28, %s4139_s10  ;;  %s4143_s17 = sshll.u32 %s4238_s13, 4  ;;  %s4144_s17 = int_to_ptr.vmem [resolvable:$false] %s4143_s17 }
  0x26   : > { %3451 = vmatpush3.bf16.msra.mxu1 %v3934_v19  ;;  %3376 = vmatprep.subr.bf16.mxu0 %v3935_v20  ;;  %v319_v51 = vld [vmem:[%s4449_s16 + $0x60] sm:$0xff]  ;;  %v321_v53 = vld [vmem:[%s4449_s16 + $0x70] sm:$0xff]  ;;  %v328_v55 = vld [vmem:[%s4449_s16 + $0xa8] sm:$0xff]  ;;  %s4145_s21 = scalar_lea.vmem %s4144_s17, 16384  ;;  %p4146_p4 = scmp.lt.s32.totalorder %s5619_s28, %s4144_s17 }
  0x27   : > { %3452 = vmatprep.subr.bf16.mxu1 %v3936_v21  ;;  %835 = vmatprep.mubr.bf16.mxu1 %v390_v39  ;;  %v326_v56 = vld [vmem:[%s4449_s16 + $0x98] sm:$0xff]  ;;  %v391_v58 = vpack.c.bf16 %v319_v51, %v315_v50  ;;  %v393_v59 = vpack.c.bf16 %v321_v53, %v317_v52  ;;  %v396_v60 = vpack.c.bf16 %v328_v55, %v324_v54  ;;  %v323_v62 = vld [vmem:[%s4449_s16 + $0x80] sm:$0xff]  ;;  %v325_v0 = vld [vmem:[%s4449_s16 + $0x90] sm:$0xff]  ;;  %p4141_p1 = pnand %p4140_p0, %p4332_p3  ;;  %p4147_p5 = scmp.lt.s32.totalorder %s4145_s21, %s4139_s10 }
  0x28   : > { %v330_v57 = vld [vmem:[%s4449_s16 + $0xb8] sm:$0xff]  ;;  %v327_v63 = vld [vmem:[%s4449_s16 + $0xa0] sm:$0xff]  ;;  %v329_v1 = vld [vmem:[%s4449_s16 + $0xb0] sm:$0xff] }
  0x29   : > { %3377 = vmatpush3.bf16.msra.mxu0 %v3937_v22  ;;  %v398_v61 = vpack.c.bf16 %v330_v57, %v326_v56  ;;  %v332_v2 = vld [vmem:[%s4449_s16 + $0xc8] sm:$0xff]  ;;  %v334_v4 = vld [vmem:[%s4449_s16 + $0xd8] sm:$0xff]  ;;  %v395_v6 = vpack.c.bf16 %v327_v63, %v323_v62  ;;  %v397_v7 = vpack.c.bf16 %v329_v1, %v325_v0  ;;  %v331_v10 = vld [vmem:[%s4449_s16 + $0xc0] sm:$0xff]  ;;  %p4142_p2 = pneg %p4141_p1  ;;  %p4148_p6 = por %p4147_p5, %p4146_p4 }
  0x2a   : > { %3453 = vmatpush3.bf16.msra.mxu1 %v3938_v23  ;;  %3378 = vmatprep.subr.bf16.mxu0 %v3939_v24  ;;  %v336_v3 = vld [vmem:[%s4449_s16 + $0xe8] sm:$0xff]  ;;  %v338_v5 = vld [vmem:[%s4449_s16 + $0xf8] sm:$0xff]  ;;  %v335_v11 = vld [vmem:[%s4449_s16 + $0xe0] sm:$0xff] }
  0x2b   : > { %3454 = vmatprep.subr.bf16.mxu1 %v3940_v25  ;;  %v400_v8 = vpack.c.bf16 %v336_v3, %v332_v2  ;;  %v402_v9 = vpack.c.bf16 %v338_v5, %v334_v4  ;;  %v333_v12 = vld [vmem:[%s4449_s16 + $0xd0] sm:$0xff]  ;;  %v340_v14 = vld [vmem:[%s4449_s16 + $0x108] sm:$0xff]  ;;  %v342_v16 = vld [vmem:[%s4449_s16 + $0x118] sm:$0xff]  ;;  %v399_v18 = vpack.c.bf16 %v335_v11, %v331_v10  ;;  %p4149_p7 = pnand %p4148_p6, %p4142_p2 }
  0x2c   : > { %v337_v13 = vld [vmem:[%s4449_s16 + $0xf0] sm:$0xff]  ;;  %v344_v15 = vld [vmem:[%s4449_s16 + $0x128] sm:$0xff]  ;;  %v346_v17 = vld [vmem:[%s4449_s16 + $0x138] sm:$0xff] }
  0x2d   : > { %3379 = vmatpush3.bf16.msra.mxu0 %v3941_v26  ;;  %v401_v19 = vpack.c.bf16 %v337_v13, %v333_v12  ;;  %v404_v20 = vpack.c.bf16 %v344_v15, %v340_v14  ;;  %v406_v21 = vpack.c.bf16 %v346_v17, %v342_v16  ;;  %v339_v22 = vld [vmem:[%s4449_s16 + $0x100] sm:$0xff]  ;;  %v341_v25 = vld [vmem:[%s4449_s16 + $0x110] sm:$0xff]  ;;  %v354_v32 = vld [vmem:[%s4449_s16 + $0x178] sm:$0xff] }
  0x2e   : > { %3455 = vmatpush3.bf16.msra.mxu1 %v3942_v27  ;;  %3380 = vmatprep.subr.bf16.mxu0 %v3943_v28  ;;  %v343_v23 = vld [vmem:[%s4449_s16 + $0x120] sm:$0xff]  ;;  %v345_v26 = vld [vmem:[%s4449_s16 + $0x130] sm:$0xff]  ;;  %v348_v27 = vld [vmem:[%s4449_s16 + $0x148] sm:$0xff] }
  0x2f   : > { %3456 = vmatprep.subr.bf16.mxu1 %v3944_v29  ;;  %v3947_v24 = vld [vmem:[%s5680_s2 + $0x40] sm:$0xff]   ;;  %v352_v28 = vld [vmem:[%s4449_s16 + $0x168] sm:$0xff]  ;;  %v403_v34 = vpack.c.bf16 %v343_v23, %v339_v22  ;;  %v3951_v35 = vld [vmem:[%s5680_s2 + $0x50] sm:$0xff]   ;;  %v405_v36 = vpack.c.bf16 %v345_v26, %v341_v25 }
  0x30   : > { %v3948_v29 = vld [vmem:[%s5680_s2] sm:$0xff]   ;;  %v3950_v33 = vld [vmem:[%s5680_s2 + $0x8] sm:$0xff]   ;;  %v408_v37 = vpack.c.bf16 %v352_v28, %v348_v27  ;;  %v3952_v41 = vld [vmem:[%s5680_s2 + $0x10] sm:$0xff]  }
  0x31   : > { %3381 = vmatpush3.bf16.msra.mxu0 %v3945_v30  ;;  %v350_v30 = vld [vmem:[%s4449_s16 + $0x158] sm:$0xff]  ;;  %v347_v39 = vld [vmem:[%s4449_s16 + $0x140] sm:$0xff]  ;;  %v349_v42 = vld [vmem:[%s4449_s16 + $0x150] sm:$0xff] }
  0x32   : > { %3457 = vmatpush3.bf16.msra.mxu1 %v3946_v31  ;;  %v3949_v31 = vld [vmem:[%s5680_s2 + $0x48] sm:$0xff]   ;;  %3518 = vmatprep.subr.bf16.mxu0 %v3947_v24  ;;  %v410_v38 = vpack.c.bf16 %v354_v32, %v350_v30  ;;  %v353_v43 = vld [vmem:[%s4449_s16 + $0x170] sm:$0xff]  ;;  %v3953_v46 = vld [vmem:[%s5680_s2 + $0x58] sm:$0xff]  }
  0x33   : > { %v360_v45 = vld [vmem:[%s4449_s16 + $0x1a8] sm:$0xff]  ;;  %v358_v47 = vld [vmem:[%s4449_s16 + $0x198] sm:$0xff]  ;;  %v3955_v50 = vld [vmem:[%s5680_s2 + $0x60] sm:$0xff]   ;;  %v409_v52 = vpack.c.bf16 %v353_v43, %v349_v42 }
  0x34   : > { %723 = vmatmul.mubr.bf16.vlgmr.msra.gmra.mrb[0].mxu0 %v387_v40  ;;  %v351_v40 = vld [vmem:[%s4449_s16 + $0x160] sm:$0xff]  ;;  %v3957_v56 = vld [vmem:[%s5680_s2 + $0x68] sm:$0xff]   ;;  %v366_v63 = vld [vmem:[%s4449_s16 + $0x1d8] sm:$0xff] }
  0x35   : > { %836 = vmatmul.mubr.bf16.vlgmr.msra.gmra.mrb[0].mxu1 %v389_v44  ;;  %730 = vmatprep.mubr.bf16.mxu0 %v392_v48  ;;  %v356_v44 = vld [vmem:[%s4449_s16 + $0x188] sm:$0xff]  ;;  %v362_v48 = vld [vmem:[%s4449_s16 + $0x1b8] sm:$0xff]  ;;  %v407_v51 = vpack.c.bf16 %v351_v40, %v347_v39  ;;  %v3956_v54 = vld [vmem:[%s5680_s2 + $0x20] sm:$0xff]  }
  0x36   : > { %843 = vmatprep.mubr.bf16.mxu1 %v394_v49  ;;  %3519 = vmatpush3.bf16.msra.mxu0 %v3948_v29  ;;  %v3954_v49 = vld [vmem:[%s5680_s2 + $0x18] sm:$0xff]   ;;  %v412_v53 = vpack.c.bf16 %v360_v45, %v356_v44  ;;  %v414_v55 = vpack.c.bf16 %v362_v48, %v358_v47  ;;  %v355_v57 = vld [vmem:[%s4449_s16 + $0x180] sm:$0xff]  ;;  %v368_v62 = vld [vmem:[%s4449_s16 + $0x1e8] sm:$0xff]  ;;  %v4235_v44 = vmov 0.0  }
  0x37   : > { %3520 = vmatprep.subr.bf16.mxu0 %v3949_v31  ;;  %v370_v0 = vld [vmem:[%s4449_s16 + $0x1f8] sm:$0xff]  ;;  %v3958_v1 = vld [vmem:[%s5680_s2 + $0x28] sm:$0xff]   ;;  %v379_v30 = vld [vmem:[%s4449_s16 + $0x240] sm:$0xff]  ;;  %998 = vst [vmem:[#allocation2] sm:$0x1] %v4235_v44 }
  0x38   : > { %v418_v5 = vpack.c.bf16 %v370_v0, %v366_v63  ;;  %v372_v10 = vld [vmem:[%s4449_s16 + $0x208] sm:$0xff]  ;;  %v374_v12 = vld [vmem:[%s4449_s16 + $0x218] sm:$0xff]  ;;  %v383_v31 = vld [vmem:[%s4449_s16 + $0x260] sm:$0xff]  ;;  %999 = vst [vmem:[#allocation2 + $0x18] sm:$0x1] %v4235_v44  ;;  %v4645_v63 = vstv %s3188_s22 }
  0x39   : > { %v376_v11 = vld [vmem:[%s4449_s16 + $0x228] sm:$0xff]  ;;  %v378_v13 = vld [vmem:[%s4449_s16 + $0x238] sm:$0xff]  ;;  %v381_v32 = vld [vmem:[%s4449_s16 + $0x250] sm:$0xff]  ;;  %1000 = vst [vmem:[#allocation2 + $0x30] sm:$0x1] %v4235_v44  ;;  %vm948_vm0 = vcmp.ge.s32.totalorder %v4645_v63, 0 }
  0x3a   : > { %3521 = vmatpush3.bf16.msra.mxu0 %v3950_v33  ;;  %v420_v16 = vpack.c.bf16 %v376_v11, %v372_v10  ;;  %v422_v17 = vpack.c.bf16 %v378_v13, %v374_v12  ;;  %v380_v22 = vld [vmem:[%s4449_s16 + $0x248] sm:$0xff]  ;;  %v382_v24 = vld [vmem:[%s4449_s16 + $0x258] sm:$0xff]  ;;  %v385_v33 = vld [vmem:[%s4449_s16 + $0x270] sm:$0xff]  ;;  %1001 = vst [vmem:[#allocation2 + $0x48] sm:$0x1] %v4235_v44  ;;  %vm958_vm1 = vcmp.lt.s32.totalorder %v4645_v63, 16 }
  0x3b   : > { %3522 = vmatprep.subr.bf16.mxu0 %v3951_v35  ;;  %v384_v23 = vld [vmem:[%s4449_s16 + $0x268] sm:$0xff]  ;;  %v386_v25 = vld [vmem:[%s4449_s16 + $0x278] sm:$0xff]  ;;  %v425_v35 = vpack.c.bf16 %v385_v33, %v381_v32  ;;  %v3965_v40 = vld [vmem:[%s5680_s2 + $0xd0] sm:$0xff]   ;;  %1002 = vst [vmem:[#allocation2 + $0x60] sm:$0x1] %v4235_v44  ;;  %v939_v13 = vadd.s32 1, %v4645_v63 }
  0x3c   : > { %731 = vmatmul.mubr.bf16.gmra.mrb[4].mxu0 %v391_v58  ;;  %v359_v58 = vld [vmem:[%s4449_s16 + $0x1a0] sm:$0xff]  ;;  %v424_v28 = vpack.c.bf16 %v384_v23, %v380_v22  ;;  %v426_v29 = vpack.c.bf16 %v386_v25, %v382_v24  ;;  %v3964_v39 = vld [vmem:[%s5680_s2 + $0x88] sm:$0xff]   ;;  %v3967_v42 = vld [vmem:[%s5680_s2 + $0xd8] sm:$0xff]   ;;  %1003 = vst [vmem:[#allocation2 + $0x78] sm:$0x1] %v4235_v44 }
  0x3d   : > { %844 = vmatmul.mubr.bf16.gmra.mrb[4].mxu1 %v393_v59  ;;  %738 = vmatprep.mubr.bf16.mxu0 %v396_v60  ;;  %v357_v59 = vld [vmem:[%s4449_s16 + $0x190] sm:$0xff]  ;;  %v411_v2 = vpack.c.bf16 %v359_v58, %v355_v57  ;;  %v3969_v43 = vld [vmem:[%s5680_s2 + $0x98] sm:$0xff]   ;;  %1004 = vst [vmem:[#allocation2 + $0x90] sm:$0x1] %v4235_v44  ;;  %1005 = vst [vmem:[#allocation2 + $0xa8] sm:$0x1] %v4235_v44 }
  0x3e   : > { %851 = vmatprep.mubr.bf16.mxu1 %v398_v61  ;;  %3523 = vmatpush3.bf16.msra.mxu0 %v3952_v41  ;;  %v361_v60 = vld [vmem:[%s4449_s16 + $0x1b0] sm:$0xff]  ;;  %v364_v61 = vld [vmem:[%s4449_s16 + $0x1c8] sm:$0xff]  ;;  %1006 = vst [vmem:[#allocation2 + $0xc0] sm:$0x1] %v4235_v44  ;;  %1007 = vst [vmem:[#allocation2 + $0xd8] sm:$0x1] %v4235_v44 }
  0x3f   : > { %3524 = vmatprep.subr.bf16.mxu0 %v3953_v46  ;;  %v413_v3 = vpack.c.bf16 %v361_v60, %v357_v59  ;;  %v416_v4 = vpack.c.bf16 %v368_v62, %v364_v61  ;;  %v3966_v41 = vld [vmem:[%s5680_s2 + $0x90] sm:$0xff]   ;;  %1008 = vst [vmem:[#allocation2 + $0x11] sm:$0x1] %v4235_v44  ;;  %1009 = vst [vmem:[#allocation2 + $0x29] sm:$0x1] %v4235_v44  ;;  %v3971_v47 = vld [vmem:[%s5680_s2 + $0xe0] sm:$0xff]  }
  0x40   : > { %1010 = vst [vmem:[#allocation2 + $0x41] sm:$0x1] %v4235_v44  ;;  %1011 = vst [vmem:[#allocation2 + $0x59] sm:$0x1] %v4235_v44  ;;  %v3961_v45 = vld [vmem:[%s5680_s2 + $0x70] sm:$0xff]   ;;  %v3972_v48 = vld [vmem:[%s5680_s2 + $0xa0] sm:$0xff]  }
  0x41   : > { %1012 = vst [vmem:[#allocation2 + $0x71] sm:$0x1] %v4235_v44  ;;  %1013 = vst [vmem:[#allocation2 + $0x89] sm:$0x1] %v4235_v44  ;;  %v3962_v46 = vld [vmem:[%s5680_s2 + $0x30] sm:$0xff]   ;;  %v3975_v57 = vld [vmem:[%s5680_s2 + $0x140] sm:$0xff]  }
  0x42   : > { %3525 = vmatpush3.bf16.msra.mxu0 %v3954_v49  ;;  %1014 = vst [vmem:[#allocation2 + $0xa1] sm:$0x1] %v4235_v44  ;;  %1015 = vst [vmem:[#allocation2 + $0xb9] sm:$0x1] %v4235_v44  ;;  %v3968_v49 = vld [vmem:[%s5680_s2 + $0x78] sm:$0xff]   ;;  %v3991_v58 = vld [vmem:[%s5680_s2 + $0x1c0] sm:$0xff]  }
  0x43   : > { %3526 = vmatprep.subr.bf16.mxu0 %v3955_v50  ;;  %1016 = vst [vmem:[#allocation2 + $0xd1] sm:$0x1] %v4235_v44  ;;  %1017 = vst [vmem:[#allocation2 + $0xe9] sm:$0x1] %v4235_v44  ;;  %v3970_v50 = vld [vmem:[%s5680_s2 + $0x38] sm:$0xff]   ;;  %vm949_vm3 = vcmp.ge.s32.totalorder %v939_v13, 0 }
  0x44   : > { %739 = vmatmul.mubr.bf16.gmra.mrb[8].mxu0 %v395_v6  ;;  %v363_v6 = vld [vmem:[%s4449_s16 + $0x1c0] sm:$0xff]  ;;  %vm4651_vm2 = vmand %vm948_vm0, %vm958_vm1  ;;  %vm959_vm4 = vcmp.lt.s32.totalorder %v939_v13, 16 }
  0x45   : > { %852 = vmatmul.mubr.bf16.gmra.mrb[8].mxu1 %v397_v7  ;;  %746 = vmatprep.mubr.bf16.mxu0 %v400_v8  ;;  %v367_v7 = vld [vmem:[%s4449_s16 + $0x1e0] sm:$0xff]  ;;  %v365_v8 = vld [vmem:[%s4449_s16 + $0x1d0] sm:$0xff]  ;;  %vm4662_vm5 = vmand %vm949_vm3, %vm959_vm4 }
  0x46   : > { %859 = vmatprep.mubr.bf16.mxu1 %v402_v9  ;;  %3527 = vmatpush3.bf16.msra.mxu0 %v3956_v54  ;;  %v369_v9 = vld [vmem:[%s4449_s16 + $0x1f0] sm:$0xff]  ;;  %v415_v14 = vpack.c.bf16 %v367_v7, %v363_v6  ;;  %v4643_v61 = vld [vmem:[%s5682_s4] ss:$0 sm:$0xff]  ;;  %vm4067_vm6 = vmpackc.low %vm4651_vm2, %vm4651_vm2 }
  0x47   : > { %3528 = vmatprep.subr.bf16.mxu0 %v3957_v56  ;;  %v417_v15 = vpack.c.bf16 %v369_v9, %v365_v8  ;;  %v3978_v54 = vld [vmem:[%s5680_s2 + $0xb0] sm:$0xff]   ;;  %v3980_v56 = vld [vmem:[%s5680_s2 + $0xb8] sm:$0xff]   ;;  %vm4070_vm10 = vmpackc.low %vm4662_vm5, %vm4662_vm5 }
  0x4a   : > { %3529 = vmatpush3.bf16.msra.mxu0 %v3958_v1 }
  0x4b   : > { %3530 = vmatprep.subr.bf16.mxu0 %v3961_v45 }
  0x4c   : > { %747 = vmatmul.mubr.bf16.gmra.mrb[12].mxu0 %v399_v18  ;;  %v371_v18 = vld [vmem:[%s4449_s16 + $0x200] sm:$0xff] }
  0x4d   : > { %860 = vmatmul.mubr.bf16.gmra.mrb[12].mxu1 %v401_v19  ;;  %754 = vmatprep.mubr.bf16.mxu0 %v404_v20  ;;  %v375_v19 = vld [vmem:[%s4449_s16 + $0x220] sm:$0xff]  ;;  %v373_v20 = vld [vmem:[%s4449_s16 + $0x210] sm:$0xff] }
  0x4e   : > { %867 = vmatprep.mubr.bf16.mxu1 %v406_v21  ;;  %v377_v21 = vld [vmem:[%s4449_s16 + $0x230] sm:$0xff]  ;;  %v419_v26 = vpack.c.bf16 %v375_v19, %v371_v18  ;;  %3531 = vmatpush3.bf16.msra.mxu0 %v3962_v46 }
  0x4f   : > { %v421_v27 = vpack.c.bf16 %v377_v21, %v373_v20  ;;  %3532 = vmatprep.subr.bf16.mxu0 %v3968_v49 }
  0x52   : > { %3533 = vmatpush3.bf16.msra.mxu0 %v3970_v50 }
  0x53   : > { %3646 = vmatprep.subr.bf16.mxu0 %v3975_v57 }
  0x54   : > { %755 = vmatmul.mubr.bf16.gmra.mrb[16].mxu0 %v403_v34  ;;  %v423_v34 = vpack.c.bf16 %v383_v31, %v379_v30 }
  0x55   : > { %868 = vmatmul.mubr.bf16.gmra.mrb[16].mxu1 %v405_v36  ;;  %762 = vmatprep.mubr.bf16.mxu0 %v408_v37  ;;  %v3959_v36 = vld [vmem:[%s5680_s2 + $0xc0] sm:$0xff]  }
  0x56   : > { %875 = vmatprep.mubr.bf16.mxu1 %v410_v38  ;;  %v3960_v37 = vld [vmem:[%s5680_s2 + $0x80] sm:$0xff]   ;;  %3582 = vmatprep.subr.bf16.mxu1 %v3959_v36  ;;  %v3963_v38 = vld [vmem:[%s5680_s2 + $0xc8] sm:$0xff]  }
  0x57   : > { %3583 = vmatpush3.bf16.msra.mxu1 %v3960_v37 }
  0x58   : > { %3584 = vmatprep.subr.bf16.mxu1 %v3963_v38 }
  0x5b   : > { %3585 = vmatpush3.bf16.msra.mxu1 %v3964_v39 }
  0x5c   : > { %763 = vmatmul.mubr.bf16.gmra.mrb[20].mxu0 %v407_v51  ;;  %3586 = vmatprep.subr.bf16.mxu1 %v3965_v40  ;;  %v3973_v51 = vld [vmem:[%s5680_s2 + $0xe8] sm:$0xff]  }
  0x5d   : > { %876 = vmatmul.mubr.bf16.gmra.mrb[20].mxu1 %v409_v52  ;;  %770 = vmatprep.mubr.bf16.mxu0 %v412_v53  ;;  %v3974_v52 = vld [vmem:[%s5680_s2 + $0xa8] sm:$0xff]   ;;  %v3976_v53 = vld [vmem:[%s5680_s2 + $0xf0] sm:$0xff]  }
  0x5e   : > { %883 = vmatprep.mubr.bf16.mxu1 %v414_v55  ;;  %v3979_v55 = vld [vmem:[%s5680_s2 + $0xf8] sm:$0xff]  }
  0x5f   : > { %3587 = vmatpush3.bf16.msra.mxu1 %v3966_v41 }
  0x60   : > { %3588 = vmatprep.subr.bf16.mxu1 %v3967_v42 }
  0x63   : > { %3589 = vmatpush3.bf16.msra.mxu1 %v3969_v43 }
  0x64   : > { %771 = vmatmul.mubr.bf16.gmra.mrb[24].mxu0 %v411_v2  ;;  %3590 = vmatprep.subr.bf16.mxu1 %v3971_v47 }
  0x65   : > { %884 = vmatmul.mubr.bf16.gmra.mrb[24].mxu1 %v413_v3  ;;  %778 = vmatprep.mubr.bf16.mxu0 %v416_v4 }
  0x66   : > { %891 = vmatprep.mubr.bf16.mxu1 %v418_v5 }
  0x67   : > { %3591 = vmatpush3.bf16.msra.mxu1 %v3972_v48 }
  0x68   : > { %3592 = vmatprep.subr.bf16.mxu1 %v3973_v51 }
  0x6b   : > { %3593 = vmatpush3.bf16.msra.mxu1 %v3974_v52 }
  0x6c   : > { %779 = vmatmul.mubr.bf16.gmra.mrb[28].mxu0 %v415_v14  ;;  %3594 = vmatprep.subr.bf16.mxu1 %v3976_v53 }
  0x6d   : > { %892 = vmatmul.mubr.bf16.gmra.mrb[28].mxu1 %v417_v15  ;;  %786 = vmatprep.mubr.bf16.mxu0 %v420_v16 }
  0x6e   : > { %899 = vmatprep.mubr.bf16.mxu1 %v422_v17 }
  0x6f   : > { %3595 = vmatpush3.bf16.msra.mxu1 %v3978_v54 }
  0x70   : > { %3596 = vmatprep.subr.bf16.mxu1 %v3979_v55 }
  0x73   : > { %3597 = vmatpush3.bf16.msra.mxu1 %v3980_v56  ;;  %v3977_v56 = vld [vmem:[%s5680_s2 + $0x100] sm:$0xff]  }
  0x74   : > { %787 = vmatmul.mubr.bf16.gmra.mrb[32].mxu0 %v419_v26  ;;  %3710 = vmatprep.subr.bf16.mxu1 %v3991_v58 }
  0x75   : > { %900 = vmatmul.mubr.bf16.gmra.mrb[32].mxu1 %v421_v27  ;;  %794 = vmatprep.mubr.bf16.mxu0 %v424_v28 }
  0x76   : > { %907 = vmatprep.mubr.bf16.mxu1 %v426_v29 }
  0x7c   : > { %795 = vmatmul.mubr.bf16.gmra.mrb[36].mxu0 %v423_v34  ;;  %v4014_v34 = vld [vmem:[%s5680_s2 + $0x218] sm:$0xff]  }
  0x7d   : > { %908 = vmatmul.mubr.bf16.gmra.mrb[36].mxu1 %v425_v35  ;;  %v940_v35 = vadd.s32 2, %v4645_v63 }
  0x7f   : > { %vm950_vm7 = vcmp.ge.s32.totalorder %v940_v35, 0  ;;  %vm960_vm8 = vcmp.lt.s32.totalorder %v940_v35, 16  ;;  %v3993_v35 = vld [vmem:[%s5680_s2 + $0x1c8] sm:$0xff]  }
  0x80   : > { %vm4686_vm9 = vmand %vm950_vm7, %vm960_vm8 }
  0x81   : > { %vm4732_vm14 = vmpackc.low %vm4686_vm9, %vm4686_vm9 }
 0x107   : > { %v3382_v59 = vpop.f32.mrb[0].mxu0 }
 0x108   : > { %v3458_v60 = vpop.f32.mrb[0].mxu1  ;;  %v3383_v62 = vpop.f32.mrb[1].mxu0 }
 0x109   : > { %v3384_v0 = vadd.f32 %v3383_v62, %v3382_v59  ;;  %v3459_v1 = vpop.f32.mrb[1].mxu1  ;;  %v3385_v2 = vpop.f32.mrb[2].mxu0  ;;  %v3981_v59 = vld [vmem:[%s5680_s2 + $0x148] sm:$0xff]  }
 0x10a   : > { %v3460_v3 = vadd.f32 %v3459_v1, %v3458_v60  ;;  %v3461_v4 = vpop.f32.mrb[2].mxu1  ;;  %v3386_v5 = vpop.f32.mrb[3].mxu0  ;;  %v941_v1 = vadd.s32 3, %v4645_v63 }
 0x10b   : > { %v725_v6 = vadd.f32 %v3384_v0, %v4643_v61  ;;  %v3387_v7 = vadd.f32 %v3386_v5, %v3385_v2  ;;  %v3462_v8 = vpop.f32.mrb[3].mxu1 }
 0x10c   : > { %v3463_v9 = vadd.f32 %v3462_v8, %v3461_v4  ;;  %vm951_vm11 = vcmp.ge.s32.totalorder %v941_v1, 0  ;;  %vm961_vm12 = vcmp.lt.s32.totalorder %v941_v1, 16 }
 0x10d   : > { %v838_v10 = vadd.f32 %v3460_v3, %v725_v6  ;;  %v728_v11 = vadd.f32 %v3387_v7, %v4643_v61  ;;  %v3982_v6 = vld [vmem:[%s5680_s2 + $0x108] sm:$0xff]   ;;  %vm4723_vm13 = vmand %vm951_vm11, %vm961_vm12 }
 0x10f   : > { %v916_v14 = vmax.f32 %v838_v10, 0.0  ;;  %v841_v15 = vadd.f32 %v3463_v9, %v728_v11  ;;  %v3388_v16 = vpop.f32.mrb[4].mxu0  ;;  %v3983_v9 = vld [vmem:[%s5680_s2 + $0x150] sm:$0xff]  }
 0x110   : > { %v3464_v17 = vpop.f32.mrb[4].mxu1  ;;  %v3389_v18 = vpop.f32.mrb[5].mxu0 }
 0x111   : > { %v978_v19 = vsel %vm4651_vm2, %v916_v14, 0.0  ;;  %v917_v20 = vmax.f32 %v841_v15, 0.0  ;;  %v3390_v21 = vadd.f32 %v3389_v18, %v3388_v16  ;;  %v3465_v22 = vpop.f32.mrb[5].mxu1  ;;  %v3391_v23 = vpop.f32.mrb[6].mxu0 }
 0x112   : > { %1018 = vst [vmem:[#allocation2 + $0x1] sm:$0xff] %v978_v19  ;;  %v3466_v24 = vadd.f32 %v3465_v22, %v3464_v17  ;;  %v3467_v25 = vpop.f32.mrb[6].mxu1  ;;  %v3392_v26 = vpop.f32.mrb[7].mxu0 }
 0x113   : > { %v979_v27 = vsel %vm4651_vm2, %v917_v20, 0.0  ;;  %v733_v28 = vadd.f32 %v3390_v21, %v4643_v61  ;;  %v3393_v29 = vadd.f32 %v3392_v26, %v3391_v23  ;;  %v3468_v30 = vpop.f32.mrb[7].mxu1  ;;  %v4068_v36 = vpack.c.bf16 %v917_v20, %v916_v14  ;;  %vm4791_vm2 = vmpackc.low %vm4723_vm13, %vm4723_vm13 }
 0x114   : > { %1019 = vst [vmem:[#allocation2 + $0x9] sm:$0xff] %v979_v27  ;;  %v3469_v31 = vadd.f32 %v3468_v30, %v3467_v25 }
 0x115   : > { %v846_v32 = vadd.f32 %v3466_v24, %v733_v28  ;;  %v736_v33 = vadd.f32 %v3393_v29, %v4643_v61  ;;  %4069 = vmatprep.mubr.msk.bf16.mxu0 %vm4067_vm6, %v4068_v36  ;;  %v3984_v28 = vld [vmem:[%s5680_s2 + $0x110] sm:$0xff]   ;;  %v3992_v29 = vld [vmem:[%s5680_s2 + $0x180] sm:$0xff]  }
 0x117   : > { %v918_v37 = vmax.f32 %v846_v32, 0.0  ;;  %v849_v38 = vadd.f32 %v3469_v31, %v736_v33  ;;  %v3394_v39 = vpop.f32.mrb[8].mxu0  ;;  %v3985_v33 = vld [vmem:[%s5680_s2 + $0x158] sm:$0xff]  }
 0x118   : > { %v3470_v40 = vpop.f32.mrb[8].mxu1  ;;  %v3395_v41 = vpop.f32.mrb[9].mxu0 }
 0x119   : > { %v980_v42 = vsel %vm4662_vm5, %v918_v37, 0.0  ;;  %v4672_v43 = vmax.f32 %v849_v38, 0.0  ;;  %v3396_v44 = vadd.f32 %v3395_v41, %v3394_v39  ;;  %v3471_v45 = vpop.f32.mrb[9].mxu1  ;;  %v3397_v46 = vpop.f32.mrb[10].mxu0  ;;  %v1038_v54 = vld [vmem:[#allocation2] sm:$0xff]  ;;  %v4016_v41 = vld [vmem:[%s5680_s2 + $0x228] sm:$0xff]  }
 0x11a   : > { %1020 = vst [vmem:[#allocation2 + $0x19] sm:$0xff] %v980_v42  ;;  %v3472_v47 = vadd.f32 %v3471_v45, %v3470_v40  ;;  %v3473_v48 = vpop.f32.mrb[10].mxu1  ;;  %v3398_v49 = vpop.f32.mrb[11].mxu0 }
 0x11b   : > { %v981_v50 = vsel %vm4662_vm5, %v4672_v43, 0.0  ;;  %v741_v51 = vadd.f32 %v3396_v44, %v4643_v61  ;;  %v3399_v52 = vadd.f32 %v3398_v49, %v3397_v46  ;;  %v3474_v53 = vpop.f32.mrb[11].mxu1  ;;  %v1039_v55 = vld [vmem:[#allocation2 + $0x8] sm:$0xff]  ;;  %v4071_v5 = vpack.c.bf16 %v4672_v43, %v918_v37  ;;  %v3986_v46 = vld [vmem:[%s5680_s2 + $0x118] sm:$0xff]  }
 0x11c   : > { %1021 = vst [vmem:[#allocation2 + $0x21] sm:$0xff] %v981_v50  ;;  %v3475_v57 = vadd.f32 %v3474_v53, %v3473_v48  ;;  %v1184_v58 = vpack.c.bf16 %v1039_v55, %v1038_v54  ;;  %v1070_v18 = vld [vmem:[#allocation2 + $0x2] sm:$0xff]  ;;  %v1071_v19 = vld [vmem:[#allocation2 + $0xa] sm:$0xff]  ;;  %v942_v37 = vadd.s32 4, %v4645_v63 }
 0x11d   : > { %v854_v60 = vadd.f32 %v3472_v47, %v741_v51  ;;  %v744_v62 = vadd.f32 %v3399_v52, %v4643_v61  ;;  %v1186_v32 = vpack.c.bf16 %v1071_v19, %v1070_v18  ;;  %v3987_v52 = vld [vmem:[%s5680_s2 + $0x160] sm:$0xff]   ;;  %v3994_v53 = vld [vmem:[%s5680_s2 + $0x188] sm:$0xff]  }
 0x11e   : > { %1872 = vmatmul.mubr.bf16.vlgmr.msra.gmra.mrb[40].mxu0 %v1184_v58  ;;  %vm952_vm15 = vcmp.ge.s32.totalorder %v942_v37, 0  ;;  %vm962_vm0 = vcmp.lt.s32.totalorder %v942_v37, 16 }
 0x11f   : > { %v920_v2 = vmax.f32 %v854_v60, 0.0  ;;  %v857_v3 = vadd.f32 %v3475_v57, %v744_v62  ;;  %v3400_v4 = vpop.f32.mrb[12].mxu0  ;;  %3647 = vmatpush3.bf16.msra.mxu0 %v3977_v56  ;;  %4072 = vmatprep.mubr.msk.bf16.mxu0 %vm4070_vm10, %v4071_v5  ;;  %v3988_v5 = vld [vmem:[%s5680_s2 + $0x120] sm:$0xff]   ;;  %vm4776_vm1 = vmand %vm952_vm15, %vm962_vm0 }
 0x120   : > { %v3476_v7 = vpop.f32.mrb[12].mxu1  ;;  %v3401_v8 = vpop.f32.mrb[13].mxu0  ;;  %3648 = vmatprep.subr.bf16.mxu0 %v3981_v59  ;;  %vm4850_vm7 = vmpackc.low %vm4776_vm1, %vm4776_vm1 }
 0x121   : > { %v982_v10 = vsel %vm4686_vm9, %v920_v2, 0.0  ;;  %v921_v11 = vmax.f32 %v857_v3, 0.0  ;;  %v3402_v12 = vadd.f32 %v3401_v8, %v3400_v4  ;;  %v3477_v13 = vpop.f32.mrb[13].mxu1  ;;  %v3403_v14 = vpop.f32.mrb[14].mxu0  ;;  %v1087_v24 = vld [vmem:[#allocation2 + $0x18] sm:$0xff] }
 0x122   : > { %1022 = vst [vmem:[#allocation2 + $0x31] sm:$0xff] %v982_v10  ;;  %v3478_v15 = vadd.f32 %v3477_v13, %v3476_v7  ;;  %v3479_v16 = vpop.f32.mrb[14].mxu1  ;;  %v3404_v17 = vpop.f32.mrb[15].mxu0  ;;  %v3989_v10 = vld [vmem:[%s5680_s2 + $0x168] sm:$0xff]   ;;  %v943_v13 = vadd.s32 5, %v4645_v63 }
 0x123   : > { %v983_v20 = vsel %vm4686_vm9, %v921_v11, 0.0  ;;  %v749_v21 = vadd.f32 %v3402_v12, %v4643_v61  ;;  %v3405_v22 = vadd.f32 %v3404_v17, %v3403_v14  ;;  %v3480_v23 = vpop.f32.mrb[15].mxu1  ;;  %v1088_v25 = vld [vmem:[#allocation2 + $0x20] sm:$0xff]  ;;  %3649 = vmatpush3.bf16.msra.mxu0 %v3982_v6  ;;  %v4736_v42 = vpack.c.bf16 %v921_v11, %v920_v2  ;;  %v3997_v6 = vld [vmem:[%s5680_s2 + $0x1d0] sm:$0xff]   ;;  %v3999_v14 = vld [vmem:[%s5680_s2 + $0x1d8] sm:$0xff]  }
 0x124   : > { %1023 = vst [vmem:[#allocation2 + $0x39] sm:$0xff] %v983_v20  ;;  %v3481_v26 = vadd.f32 %v3480_v23, %v3479_v16  ;;  %v1187_v27 = vpack.c.bf16 %v1088_v25, %v1087_v24  ;;  %3650 = vmatprep.subr.bf16.mxu0 %v3983_v9  ;;  %v1072_v57 = vld [vmem:[#allocation2 + $0x1a] sm:$0xff]  ;;  %v1073_v58 = vld [vmem:[#allocation2 + $0x22] sm:$0xff]  ;;  %v3998_v11 = vld [vmem:[%s5680_s2 + $0x190] sm:$0xff]   ;;  %vm953_vm3 = vcmp.ge.s32.totalorder %v943_v13, 0  ;;  %vm963_vm4 = vcmp.lt.s32.totalorder %v943_v13, 16 }
 0x125   : > { %v4712_v30 = vadd.f32 %v3478_v15, %v749_v21  ;;  %v752_v31 = vadd.f32 %v3405_v22, %v4643_v61  ;;  %v4766_v9 = vpack.c.bf16 %v1073_v58, %v1072_v57  ;;  %v3990_v22 = vld [vmem:[%s5680_s2 + $0x128] sm:$0xff]   ;;  %vm4835_vm6 = vmand %vm953_vm3, %vm963_vm4 }
 0x126   : > { %1968 = vmatprep.mubr.bf16.mxu1 %v1187_v27  ;;  %1880 = vmatmul.mubr.bf16.gmra.mrb[44].mxu0 %v1187_v27  ;;  %vm4903_vm11 = vmpackc.low %vm4835_vm6, %vm4835_vm6 }
 0x127   : > { %v922_v38 = vmax.f32 %v4712_v30, 0.0  ;;  %v865_v39 = vadd.f32 %v3481_v26, %v752_v31  ;;  %v3406_v40 = vpop.f32.mrb[16].mxu0  ;;  %1969 = vmatmul.mubr.bf16.vlgmr.msra.gmra.mrb[40].mxu1 %v1186_v32  ;;  %4075 = vmatprep.mubr.msk.bf16.mxu0 %vm4732_vm14, %v4736_v42 }
 0x128   : > { %v3482_v44 = vpop.f32.mrb[16].mxu1  ;;  %v3407_v45 = vpop.f32.mrb[17].mxu0  ;;  %3651 = vmatpush3.bf16.msra.mxu0 %v3984_v28  ;;  %3711 = vmatpush3.bf16.msra.mxu1 %v3992_v29  ;;  %v3995_v28 = vld [vmem:[%s5680_s2 + $0x170] sm:$0xff]   ;;  %v4000_v29 = vld [vmem:[%s5680_s2 + $0x198] sm:$0xff]  }
 0x129   : > { %v984_v47 = vsel %vm4723_vm13, %v922_v38, 0.0  ;;  %v923_v48 = vmax.f32 %v865_v39, 0.0  ;;  %v3408_v49 = vadd.f32 %v3407_v45, %v3406_v40  ;;  %v3483_v50 = vpop.f32.mrb[17].mxu1  ;;  %v3409_v51 = vpop.f32.mrb[18].mxu0  ;;  %3652 = vmatprep.subr.bf16.mxu0 %v3985_v33  ;;  %3712 = vmatprep.subr.bf16.mxu1 %v3993_v35  ;;  %v1089_v1 = vld [vmem:[#allocation2 + $0x30] sm:$0xff] }
 0x12a   : > { %1024 = vst [vmem:[#allocation2 + $0x49] sm:$0xff] %v984_v47  ;;  %v3484_v54 = vadd.f32 %v3483_v50, %v3482_v44  ;;  %v3485_v55 = vpop.f32.mrb[18].mxu1  ;;  %v3410_v56 = vpop.f32.mrb[19].mxu0  ;;  %v3996_v47 = vld [vmem:[%s5680_s2 + $0x130] sm:$0xff]  }
 0x12b   : > { %v985_v59 = vsel %vm4723_vm13, %v923_v48, 0.0  ;;  %v757_v60 = vadd.f32 %v3408_v49, %v4643_v61  ;;  %v3411_v62 = vadd.f32 %v3410_v56, %v3409_v51  ;;  %v3486_v0 = vpop.f32.mrb[19].mxu1  ;;  %v1090_v2 = vld [vmem:[#allocation2 + $0x38] sm:$0xff]  ;;  %v4795_v19 = vpack.c.bf16 %v923_v48, %v922_v38  ;;  %v4003_v48 = vld [vmem:[%s5680_s2 + $0x1e0] sm:$0xff]   ;;  %v4005_v56 = vld [vmem:[%s5680_s2 + $0x1e8] sm:$0xff]  }
 0x12c   : > { %1025 = vst [vmem:[#allocation2 + $0x51] sm:$0xff] %v985_v59  ;;  %v3487_v3 = vadd.f32 %v3486_v0, %v3485_v55  ;;  %v4755_v4 = vpack.c.bf16 %v1090_v2, %v1089_v1  ;;  %3653 = vmatpush3.bf16.msra.mxu0 %v3986_v46  ;;  %3713 = vmatpush3.bf16.msra.mxu1 %v3994_v53  ;;  %v1074_v33 = vld [vmem:[#allocation2 + $0x32] sm:$0xff]  ;;  %v1075_v35 = vld [vmem:[#allocation2 + $0x3a] sm:$0xff]  ;;  %v944_v55 = vadd.s32 6, %v4645_v63 }
 0x12d   : > { %v4763_v7 = vadd.f32 %v3484_v54, %v757_v60  ;;  %v760_v8 = vadd.f32 %v3411_v62, %v4643_v61  ;;  %3654 = vmatprep.subr.bf16.mxu0 %v3987_v52  ;;  %3714 = vmatprep.subr.bf16.mxu1 %v3997_v6  ;;  %v4825_v51 = vpack.c.bf16 %v1075_v35, %v1074_v33  ;;  %v4001_v52 = vld [vmem:[%s5680_s2 + $0x178] sm:$0xff]   ;;  %v4004_v53 = vld [vmem:[%s5680_s2 + $0x1a0] sm:$0xff]   ;;  %v945_v33 = vadd.s32 7, %v4645_v63 }
 0x12e   : > { %1976 = vmatprep.mubr.bf16.mxu1 %v4755_v4  ;;  %1888 = vmatmul.mubr.bf16.gmra.mrb[48].mxu0 %v4755_v4  ;;  %v4002_v2 = vld [vmem:[%s5680_s2 + $0x138] sm:$0xff]   ;;  %vm954_vm8 = vcmp.ge.s32.totalorder %v944_v55, 0  ;;  %vm964_vm9 = vcmp.lt.s32.totalorder %v944_v55, 16 }
 0x12f   : > { %v924_v15 = vmax.f32 %v4763_v7, 0.0  ;;  %v873_v16 = vadd.f32 %v3487_v3, %v760_v8  ;;  %v3412_v17 = vpop.f32.mrb[20].mxu0  ;;  %1977 = vmatmul.mubr.bf16.gmra.mrb[44].mxu1 %v4766_v9  ;;  %4078 = vmatprep.mubr.msk.bf16.mxu0 %vm4791_vm2, %v4795_v19  ;;  %vm4889_vm10 = vmand %vm954_vm8, %vm964_vm9  ;;  %v4010_v35 = vld [vmem:[%s5680_s2 + $0x1f8] sm:$0xff]   ;;  %vm955_vm12 = vcmp.ge.s32.totalorder %v945_v33, 0  ;;  %vm965_vm13 = vcmp.lt.s32.totalorder %v945_v33, 16 }
 0x130   : > { %v3488_v20 = vpop.f32.mrb[20].mxu1  ;;  %v3413_v21 = vpop.f32.mrb[21].mxu0  ;;  %3655 = vmatpush3.bf16.msra.mxu0 %v3988_v5  ;;  %3715 = vmatpush3.bf16.msra.mxu1 %v3998_v11  ;;  %v4870_v11 = vld [vmem:[%s5680_s2 + $0x200] sm:$0xff]   ;;  %vm4926_vm15 = vmand %vm955_vm12, %vm965_vm13  ;;  %vm4236_vm12 = vmmov 1  }
 0x131   : > { %v986_v23 = vsel %vm4776_vm1, %v924_v15, 0.0  ;;  %v925_v24 = vmax.f32 %v873_v16, 0.0  ;;  %v3414_v25 = vadd.f32 %v3413_v21, %v3412_v17  ;;  %v3489_v26 = vpop.f32.mrb[21].mxu1  ;;  %v3415_v27 = vpop.f32.mrb[22].mxu0  ;;  %3656 = vmatprep.subr.bf16.mxu0 %v3989_v10  ;;  %3716 = vmatprep.subr.bf16.mxu1 %v3999_v14  ;;  %v1091_v40 = vld [vmem:[#allocation2 + $0x48] sm:$0xff]  ;;  %vm4937_vm0 = vmpackc.low %vm4889_vm10, %vm4889_vm10 }
 0x132   : > { %1026 = vst [vmem:[#allocation2 + $0x61] sm:$0xff] %v986_v23  ;;  %v3490_v30 = vadd.f32 %v3489_v26, %v3488_v20  ;;  %v3491_v31 = vpop.f32.mrb[22].mxu1  ;;  %v3416_v32 = vpop.f32.mrb[23].mxu0  ;;  %v4006_v10 = vld [vmem:[%s5680_s2 + $0x1a8] sm:$0xff]   ;;  %vm4091_vm13 = vmpackc.low %vm4662_vm5, %vm4236_vm12 }
 0x133   : > { %v987_v36 = vsel %vm4776_vm1, %v925_v24, 0.0  ;;  %v765_v37 = vadd.f32 %v3414_v25, %v4643_v61  ;;  %v3417_v38 = vadd.f32 %v3416_v32, %v3415_v27  ;;  %v3492_v39 = vpop.f32.mrb[23].mxu1  ;;  %v1092_v44 = vld [vmem:[#allocation2 + $0x50] sm:$0xff]  ;;  %v4854_v62 = vpack.c.bf16 %v925_v24, %v924_v15 }
 0x134   : > { %1027 = vst [vmem:[#allocation2 + $0x69] sm:$0xff] %v987_v36  ;;  %v3493_v45 = vadd.f32 %v3492_v39, %v3491_v31  ;;  %v4814_v46 = vpack.c.bf16 %v1092_v44, %v1091_v40  ;;  %3657 = vmatpush3.bf16.msra.mxu0 %v3990_v22  ;;  %3717 = vmatpush3.bf16.msra.mxu1 %v4000_v29  ;;  %v1076_v15 = vld [vmem:[#allocation2 + $0x4a] sm:$0xff]  ;;  %v1077_v16 = vld [vmem:[#allocation2 + $0x52] sm:$0xff] }
 0x135   : > { %v4822_v49 = vadd.f32 %v3490_v30, %v765_v37  ;;  %v768_v50 = vadd.f32 %v3417_v38, %v4643_v61  ;;  %3658 = vmatprep.subr.bf16.mxu0 %v3995_v28  ;;  %3718 = vmatprep.subr.bf16.mxu1 %v4003_v48  ;;  %v4008_v27 = vld [vmem:[%s5680_s2 + $0x1f0] sm:$0xff]   ;;  %v4881_v30 = vpack.c.bf16 %v1077_v16, %v1076_v15 }
 0x136   : > { %1984 = vmatprep.mubr.bf16.mxu1 %v4814_v46  ;;  %1896 = vmatmul.mubr.bf16.gmra.mrb[52].mxu0 %v4814_v46  ;;  %v4009_v31 = vld [vmem:[%s5680_s2 + $0x1b0] sm:$0xff]  }
 0x137   : > { %v926_v57 = vmax.f32 %v4822_v49, 0.0  ;;  %v881_v58 = vadd.f32 %v3493_v45, %v768_v50  ;;  %v3418_v59 = vpop.f32.mrb[24].mxu0  ;;  %1985 = vmatmul.mubr.bf16.gmra.mrb[48].mxu1 %v4825_v51  ;;  %4081 = vmatprep.mubr.msk.bf16.mxu0 %vm4850_vm7, %v4854_v62 }
 0x138   : > { %v3494_v0 = vpop.f32.mrb[24].mxu1  ;;  %v3419_v1 = vpop.f32.mrb[25].mxu0  ;;  %3659 = vmatpush3.bf16.msra.mxu0 %v3996_v47  ;;  %3719 = vmatpush3.bf16.msra.mxu1 %v4004_v53  ;;  %v4011_v53 = vld [vmem:[%s5680_s2 + $0x1b8] sm:$0xff]  }
 0x139   : > { %v988_v3 = vsel %vm4835_vm6, %v926_v57, 0.0  ;;  %v927_v5 = vmax.f32 %v881_v58, 0.0  ;;  %v3420_v6 = vadd.f32 %v3419_v1, %v3418_v59  ;;  %v3495_v7 = vpop.f32.mrb[25].mxu1  ;;  %v3421_v8 = vpop.f32.mrb[26].mxu0  ;;  %3660 = vmatprep.subr.bf16.mxu0 %v4001_v52  ;;  %3720 = vmatprep.subr.bf16.mxu1 %v4005_v56  ;;  %v1093_v23 = vld [vmem:[#allocation2 + $0x60] sm:$0xff] }
 0x13a   : > { %1028 = vst [vmem:[#allocation2 + $0x79] sm:$0xff] %v988_v3  ;;  %v3496_v12 = vadd.f32 %v3495_v7, %v3494_v0  ;;  %v3497_v13 = vpop.f32.mrb[26].mxu1  ;;  %v3422_v14 = vpop.f32.mrb[27].mxu0 }
 0x13b   : > { %v989_v17 = vsel %vm4835_vm6, %v927_v5, 0.0  ;;  %v773_v20 = vadd.f32 %v3420_v6, %v4643_v61  ;;  %v3423_v21 = vadd.f32 %v3422_v14, %v3421_v8  ;;  %v3498_v22 = vpop.f32.mrb[27].mxu1  ;;  %v1094_v24 = vld [vmem:[#allocation2 + $0x68] sm:$0xff]  ;;  %v4907_v40 = vpack.c.bf16 %v927_v5, %v926_v57  ;;  %vm4973_vm6 = vmpackc.low %vm4926_vm15, %vm4926_vm15 }
 0x13c   : > { %1029 = vst [vmem:[#allocation2 + $0x81] sm:$0xff] %v989_v17  ;;  %v3499_v25 = vadd.f32 %v3498_v22, %v3497_v13  ;;  %v4875_v26 = vpack.c.bf16 %v1094_v24, %v1093_v23  ;;  %3661 = vmatpush3.bf16.msra.mxu0 %v4002_v2  ;;  %3721 = vmatpush3.bf16.msra.mxu1 %v4006_v10  ;;  %v1078_v57 = vld [vmem:[#allocation2 + $0x62] sm:$0xff]  ;;  %v1079_v58 = vld [vmem:[#allocation2 + $0x6a] sm:$0xff]  ;;  %v946_v14 = vadd.s32 8, %v4645_v63 }
 0x13d   : > { %v886_v28 = vadd.f32 %v3496_v12, %v773_v20  ;;  %v776_v29 = vadd.f32 %v3423_v21, %v4643_v61  ;;  %3790 = vmatprep.subr.bf16.mxu0 %v4870_v11  ;;  %3722 = vmatprep.subr.bf16.mxu1 %v4008_v27  ;;  %v4923_v12 = vpack.c.bf16 %v1079_v58, %v1078_v57  ;;  %v4019_v20 = vld [vmem:[%s5681_s3] ss:$16 sps:$4 sm:$0xff]  }
 0x13e   : > { %1992 = vmatprep.mubr.bf16.mxu1 %v4875_v26  ;;  %1904 = vmatmul.mubr.bf16.gmra.mrb[56].mxu0 %v4875_v26  ;;  %vm956_vm1 = vcmp.ge.s32.totalorder %v946_v14, 0  ;;  %vm966_vm3 = vcmp.lt.s32.totalorder %v946_v14, 16 }
 0x13f   : > { %v928_v36 = vmax.f32 %v886_v28, 0.0  ;;  %v889_v37 = vadd.f32 %v3499_v25, %v776_v29  ;;  %v3424_v38 = vpop.f32.mrb[28].mxu0  ;;  %1993 = vmatmul.mubr.bf16.gmra.mrb[52].mxu1 %v4881_v30  ;;  %4084 = vmatprep.mubr.msk.bf16.mxu0 %vm4903_vm11, %v4907_v40  ;;  %vm4959_vm4 = vmand %vm956_vm1, %vm966_vm3 }
 0x140   : > { %v3500_v44 = vpop.f32.mrb[28].mxu1  ;;  %v3425_v45 = vpop.f32.mrb[29].mxu0  ;;  %3723 = vmatpush3.bf16.msra.mxu1 %v4009_v31  ;;  %vm4130_vm5 = vmpackc.low %vm4959_vm4, %vm4959_vm4 }
 0x141   : > { %v990_v47 = vsel %vm4889_vm10, %v928_v36, 0.0  ;;  %v929_v48 = vmax.f32 %v889_v37, 0.0  ;;  %v3426_v49 = vadd.f32 %v3425_v45, %v3424_v38  ;;  %v3501_v50 = vpop.f32.mrb[29].mxu1  ;;  %v3427_v52 = vpop.f32.mrb[30].mxu0  ;;  %3724 = vmatprep.subr.bf16.mxu1 %v4010_v35  ;;  %v1095_v3 = vld [vmem:[#allocation2 + $0x78] sm:$0xff] }
 0x142   : > { %1030 = vst [vmem:[#allocation2 + $0x91] sm:$0xff] %v990_v47  ;;  %v3502_v54 = vadd.f32 %v3501_v50, %v3500_v44  ;;  %v3503_v55 = vpop.f32.mrb[30].mxu1  ;;  %v3428_v56 = vpop.f32.mrb[31].mxu0 }
 0x143   : > { %v991_v59 = vsel %vm4889_vm10, %v929_v48, 0.0  ;;  %v781_v0 = vadd.f32 %v3426_v49, %v4643_v61  ;;  %v3429_v1 = vadd.f32 %v3428_v56, %v3427_v52  ;;  %v3504_v2 = vpop.f32.mrb[31].mxu1  ;;  %v1096_v5 = vld [vmem:[#allocation2 + $0x80] sm:$0xff]  ;;  %v4941_v21 = vpack.c.bf16 %v929_v48, %v928_v36 }
 0x144   : > { %1031 = vst [vmem:[#allocation2 + $0x99] sm:$0xff] %v991_v59  ;;  %v3505_v6 = vadd.f32 %v3504_v2, %v3503_v55  ;;  %v4920_v7 = vpack.c.bf16 %v1096_v5, %v1095_v3  ;;  %3725 = vmatpush3.bf16.msra.mxu1 %v4011_v53  ;;  %v1080_v35 = vld [vmem:[#allocation2 + $0x7a] sm:$0xff]  ;;  %v1081_v36 = vld [vmem:[#allocation2 + $0x82] sm:$0xff]  ;;  %v947_v56 = vadd.s32 9, %v4645_v63 }
 0x145   : > { %v894_v8 = vadd.f32 %v3502_v54, %v781_v0  ;;  %v784_v10 = vadd.f32 %v3429_v1, %v4643_v61  ;;  %v4956_v54 = vpack.c.bf16 %v1081_v36, %v1080_v35  ;;  %v4030_v55 = vld [vmem:[%s5681_s3 + $0x64] ss:$16 sps:$4 sm:$0xff]   ;;  %v4031_v59 = vld [vmem:[%s5681_s3 + $0x80] ss:$16 sps:$4 sm:$0xff]  }
 0x146   : > { %2000 = vmatprep.mubr.bf16.mxu1 %v4920_v7  ;;  %1912 = vmatmul.mubr.bf16.gmra.mrb[60].mxu0 %v4920_v7  ;;  %vm957_vm8 = vcmp.ge.s32.totalorder %v947_v56, 0  ;;  %vm967_vm9 = vcmp.lt.s32.totalorder %v947_v56, 16 }
 0x147   : > { %v930_v15 = vmax.f32 %v894_v8, 0.0  ;;  %v897_v16 = vadd.f32 %v3505_v6, %v784_v10  ;;  %v3430_v17 = vpop.f32.mrb[32].mxu0  ;;  %2001 = vmatmul.mubr.bf16.gmra.mrb[56].mxu1 %v4923_v12  ;;  %4087 = vmatprep.mubr.msk.bf16.mxu0 %vm4937_vm0, %v4941_v21  ;;  %vm5002_vm10 = vmand %vm957_vm8, %vm967_vm9 }
 0x148   : > { %v3431_v22 = vpop.f32.mrb[33].mxu0  ;;  %v3506_v23 = vpop.f32.mrb[32].mxu1 }
 0x149   : > { %v992_v24 = vsel %vm4926_vm15, %v930_v15, 0.0  ;;  %v931_v25 = vmax.f32 %v897_v16, 0.0  ;;  %v3432_v27 = vadd.f32 %v3431_v22, %v3430_v17  ;;  %v3433_v28 = vpop.f32.mrb[34].mxu0  ;;  %v3507_v29 = vpop.f32.mrb[33].mxu1  ;;  %v1097_v47 = vld [vmem:[#allocation2 + $0x90] sm:$0xff] }
 0x14a   : > { %1032 = vst [vmem:[#allocation2 + $0xa9] sm:$0xff] %v992_v24  ;;  %v3434_v31 = vpop.f32.mrb[35].mxu0  ;;  %v3508_v32 = vadd.f32 %v3507_v29, %v3506_v23  ;;  %v3509_v33 = vpop.f32.mrb[34].mxu1 }
 0x14b   : > { %v993_v37 = vsel %vm4926_vm15, %v931_v25, 0.0  ;;  %v789_v38 = vadd.f32 %v3432_v27, %v4643_v61  ;;  %v3435_v44 = vadd.f32 %v3434_v31, %v3433_v28  ;;  %v3510_v45 = vpop.f32.mrb[35].mxu1  ;;  %v1098_v48 = vld [vmem:[#allocation2 + $0x98] sm:$0xff]  ;;  %v4977_v0 = vpack.c.bf16 %v931_v25, %v930_v15 }
 0x14c   : > { %1033 = vst [vmem:[#allocation2 + $0xb1] sm:$0xff] %v993_v37  ;;  %v3511_v49 = vadd.f32 %v3510_v45, %v3509_v33  ;;  %v4951_v50 = vpack.c.bf16 %v1098_v48, %v1097_v47  ;;  %v1082_v13 = vld [vmem:[#allocation2 + $0x92] sm:$0xff]  ;;  %v1083_v14 = vld [vmem:[#allocation2 + $0x9a] sm:$0xff] }
 0x14d   : > { %v792_v52 = vadd.f32 %v3435_v44, %v4643_v61  ;;  %v4954_v53 = vadd.f32 %v3508_v32, %v789_v38  ;;  %v4994_v32 = vpack.c.bf16 %v1083_v14, %v1082_v13  ;;  %v1103_v44 = vld [vmem:[#allocation2 + $0x19] sm:$0xff]  ;;  %v4042_v14 = vld [vmem:[%s5681_s3 + $0xa4] ss:$16 sps:$4 sm:$0xff]  }
 0x14e   : > { %2008 = vmatprep.mubr.bf16.mxu1 %v4951_v50  ;;  %1920 = vmatmul.mubr.bf16.gmra.mrb[64].mxu0 %v4951_v50  ;;  %v4040_v13 = vld [vmem:[%s5681_s3 + $0xa0] ss:$16 sps:$4 sm:$0xff]  }
 0x14f   : > { %v932_v57 = vmax.f32 %v4954_v53, 0.0  ;;  %v4967_v58 = vadd.f32 %v3511_v49, %v792_v52  ;;  %2009 = vmatmul.mubr.bf16.gmra.mrb[60].mxu1 %v4956_v54  ;;  %4090 = vmatprep.mubr.msk.bf16.mxu0 %vm4973_vm6, %v4977_v0  ;;  %v3436_v63 = vpop.f32.mrb[36].mxu0  ;;  %v4027_v53 = vld [vmem:[%s5681_s3 + $0x44] ss:$16 sps:$4 sm:$0xff]  }
 0x150   : > { %v3437_v1 = vpop.f32.mrb[37].mxu0  ;;  %v3512_v2 = vpop.f32.mrb[36].mxu1 }
 0x151   : > { %v994_v3 = vsel %vm4959_vm4, %v932_v57, 0.0  ;;  %v933_v5 = vmax.f32 %v4967_v58, 0.0  ;;  %v3438_v6 = vadd.f32 %v3437_v1, %v3436_v63  ;;  %v3439_v8 = vpop.f32.mrb[38].mxu0  ;;  %v3513_v10 = vpop.f32.mrb[37].mxu1  ;;  %v1099_v23 = vld [vmem:[#allocation2 + $0xa8] sm:$0xff] }
 0x152   : > { %1034 = vst [vmem:[#allocation2 + $0xc1] sm:$0xff] %v994_v3  ;;  %v3440_v15 = vpop.f32.mrb[39].mxu0  ;;  %v3514_v16 = vadd.f32 %v3513_v10, %v3512_v2  ;;  %v3515_v17 = vpop.f32.mrb[38].mxu1  ;;  %v4012_v1 = vld [vmem:[%s5680_s2 + $0x208] sm:$0xff]   ;;  %v4092_v2 = vpack.c.bf16 %v4672_v43, %v1103_v44  ;;  %v4013_v3 = vld [vmem:[%s5680_s2 + $0x210] sm:$0xff]   ;;  %v4015_v43 = vld [vmem:[%s5680_s2 + $0x220] sm:$0xff]  }
 0x153   : > { %v995_v22 = vsel %vm4959_vm4, %v933_v5, 0.0  ;;  %v1100_v24 = vld [vmem:[#allocation2 + $0xb0] sm:$0xff]  ;;  %v797_v25 = vadd.f32 %v3438_v6, %v4643_v61  ;;  %v3441_v27 = vadd.f32 %v3440_v15, %v3439_v8  ;;  %v3516_v28 = vpop.f32.mrb[39].mxu1  ;;  %v4131_v60 = vpack.c.bf16 %v933_v5, %v932_v57  ;;  %v4036_v57 = vld [vmem:[%s5681_s3 + $0xc] ss:$16 sps:$4 sm:$0xff]  }
 0x154   : > { %1035 = vst [vmem:[#allocation2 + $0xc9] sm:$0xff] %v995_v22  ;;  %v4992_v29 = vpack.c.bf16 %v1100_v24, %v1099_v23  ;;  %v3517_v31 = vadd.f32 %v3516_v28, %v3515_v17  ;;  %v1084_v48 = vld [vmem:[#allocation2 + $0xaa] sm:$0xff]  ;;  %v1085_v49 = vld [vmem:[#allocation2 + $0xb2] sm:$0xff] }
 0x155   : > { %v800_v33 = vadd.f32 %v3441_v27, %v4643_v61  ;;  %v4997_v35 = vadd.f32 %v3514_v16, %v797_v25  ;;  %v5022_v63 = vpack.c.bf16 %v1085_v49, %v1084_v48  ;;  %v5150_v58 = vld [vmem:[%s5681_s3 + $0x8] ss:$16 sps:$4 sm:$0xff]   ;;  %v5162_v5 = vld [vmem:[%s5681_s3 + $0x2c] ss:$16 sps:$4 sm:$0xff]   ;;  %v4049_v23 = vld [vmem:[%s5681_s3 + $0xc0] ss:$16 sps:$4 sm:$0xff]  }
 0x156   : > { %2016 = vmatprep.mubr.bf16.mxu1 %v4992_v29  ;;  %1928 = vmatmul.mubr.bf16.gmra.mrb[68].mxu0 %v4992_v29  ;;  %v5167_v6 = vld [vmem:[%s5681_s3 + $0x28] ss:$16 sps:$4 sm:$0xff]   ;;  %v5174_v8 = vld [vmem:[%s5681_s3 + $0x4c] ss:$16 sps:$4 sm:$0xff]   ;;  %v4051_v24 = vld [vmem:[%s5681_s3 + $0xc4] ss:$16 sps:$4 sm:$0xff]  }
 0x157   : > { %2017 = vmatmul.mubr.bf16.gmra.mrb[64].mxu1 %v4994_v32  ;;  %2065 = vmatprep.mubr.bf16.mxu0 %v4766_v9  ;;  %v934_v37 = vmax.f32 %v4997_v35, 0.0  ;;  %v5009_v38 = vadd.f32 %v3517_v31, %v800_v33  ;;  %v5179_v10 = vld [vmem:[%s5681_s3 + $0x48] ss:$16 sps:$4 sm:$0xff]   ;;  %v5192_v15 = vld [vmem:[%s5681_s3 + $0x6c] ss:$16 sps:$4 sm:$0xff]  }
 0x158   : > { %v5197_v16 = vld [vmem:[%s5681_s3 + $0x68] ss:$16 sps:$4 sm:$0xff]   ;;  %v5204_v17 = vld [vmem:[%s5681_s3 + $0x8c] ss:$16 sps:$4 sm:$0xff]  }
 0x159   : > { %v1101_v61 = vld [vmem:[#allocation2 + $0xc0] sm:$0xff]  ;;  %v996_v45 = vsel %vm5002_vm10, %v934_v37, 0.0  ;;  %v935_v47 = vmax.f32 %v5009_v38, 0.0  ;;  %v5209_v22 = vld [vmem:[%s5681_s3 + $0x88] ss:$16 sps:$4 sm:$0xff]  }
 0x15a   : > { %1036 = vst [vmem:[#allocation2 + $0xd9] sm:$0xff] %v996_v45  ;;  %v5222_v25 = vld [vmem:[%s5681_s3 + $0xac] ss:$16 sps:$4 sm:$0xff]   ;;  %v5227_v27 = vld [vmem:[%s5681_s3 + $0xa8] ss:$16 sps:$4 sm:$0xff]  }
 0x15b   : > { %v1102_v52 = vld [vmem:[#allocation2 + $0xc8] sm:$0xff]  ;;  %v997_v9 = vsel %vm5002_vm10, %v935_v47, 0.0  ;;  %v4058_v38 = vld [vmem:[%s5681_s3 + $0xe0] ss:$16 sps:$4 sm:$0xff]  }
 0x15c   : > { %v5020_v56 = vpack.c.bf16 %v1102_v52, %v1101_v61  ;;  %1037 = vst [vmem:[#allocation2 + $0xe1] sm:$0xff] %v997_v9  ;;  %v1133_v18 = vld [vmem:[#allocation2 + $0xc2] sm:$0xff]  ;;  %v5234_v31 = vld [vmem:[%s5681_s3 + $0xcc] ss:$16 sps:$4 sm:$0xff]  }
 0x15d   : > { %v5239_v35 = vld [vmem:[%s5681_s3 + $0xc8] ss:$16 sps:$4 sm:$0xff]   ;;  %v4060_v61 = vld [vmem:[%s5681_s3 + $0xe4] ss:$16 sps:$4 sm:$0xff]   ;;  %v5252_v44 = vld [vmem:[%s5681_s3 + $0xec] ss:$16 sps:$4 sm:$0xff]  }
 0x15e   : > { %2024 = vmatprep.mubr.bf16.mxu1 %v5020_v56  ;;  %4093 = vmatmul.mubr.msk.bf16.vlgmr.msra.gmra.mrb[72].mxu0 %vm4091_vm13, %v4092_v2  ;;  %v5257_v45 = vld [vmem:[%s5681_s3 + $0xe8] ss:$16 sps:$4 sm:$0xff]  }
 0x15f   : > { %2025 = vmatmul.mubr.bf16.gmra.mrb[68].mxu1 %v5022_v63  ;;  %3791 = vmatpush3.bf16.msra.mxu0 %v4870_v11 }
 0x160   : > { %2073 = vmatprep.mubr.bf16.mxu0 %v4825_v51  ;;  %4096 = vmatprep.mubr.msk.bf16.mxu1 %vm4732_vm14, %v4736_v42 }
 0x161   : > { %3792 = vmatprep.subr.bf16.mxu0 %v4012_v1  ;;  %v1150_v11 = vld [vmem:[#allocation2 + $0xd8] sm:$0xff] }
 0x163   : > { %3793 = vmatpush3.bf16.msra.mxu0 %v4012_v1  ;;  %v4237_v1 = vmov 0  }
 0x164   : > { %3794 = vmatprep.subr.bf16.mxu0 %v4013_v3 }
 0x166   : > { %4099 = vmatmul.mubr.msk.bf16.gmra.mrb[76].mxu0 %vm4732_vm14, %v4736_v42  ;;  %v4017_v42 = vld [vmem:[%s5680_s2 + $0x230] sm:$0xff]   ;;  %vm4136_vm14 = vmpackc.low %vm5002_vm10, %vm5002_vm10 }
 0x167   : > { %2163 = vmatmul.mubr.bf16.vlgmr.msra.gmra.mrb[72].mxu1 %v4755_v4  ;;  %2081 = vmatprep.mubr.bf16.mxu0 %v4881_v30  ;;  %v4018_v4 = vld [vmem:[%s5680_s2 + $0x238] sm:$0xff]  }
 0x168   : > { %4102 = vmatprep.mubr.msk.bf16.mxu1 %vm4791_vm2, %v4795_v19  ;;  %3795 = vmatpush3.bf16.msra.mxu0 %v4013_v3 }
 0x169   : > { %3796 = vmatprep.subr.bf16.mxu0 %v4014_v34 }
 0x16c   : > { %3797 = vmatpush3.bf16.msra.mxu0 %v4014_v34 }
 0x16d   : > { %3798 = vmatprep.subr.bf16.mxu0 %v4015_v43 }
 0x16e   : > { %4105 = vmatmul.mubr.msk.bf16.gmra.mrb[80].mxu0 %vm4791_vm2, %v4795_v19  ;;  %v1134_v19 = vld [vmem:[#allocation2 + $0xca] sm:$0xff] }
 0x16f   : > { %2171 = vmatmul.mubr.bf16.gmra.mrb[76].mxu1 %v4814_v46  ;;  %2089 = vmatprep.mubr.bf16.mxu0 %v4923_v12  ;;  %v1252_v46 = vpack.c.bf16 %v1134_v19, %v1133_v18 }
 0x170   : > { %4108 = vmatprep.mubr.msk.bf16.mxu1 %vm4850_vm7, %v4854_v62  ;;  %3799 = vmatpush3.bf16.msra.mxu0 %v4015_v43 }
 0x171   : > { %3800 = vmatprep.subr.bf16.mxu0 %v4016_v41 }
 0x174   : > { %3801 = vmatpush3.bf16.msra.mxu0 %v4016_v41 }
 0x175   : > { %3802 = vmatprep.subr.bf16.mxu0 %v4017_v42 }
 0x176   : > { %4111 = vmatmul.mubr.msk.bf16.gmra.mrb[84].mxu0 %vm4850_vm7, %v4854_v62  ;;  %v4137_v62 = vpack.c.bf16 %v935_v47, %v934_v37  ;;  %v5263_v47 = vld [vmem:[%s5683_s5] ss:$0 sm:$0xff] }
 0x177   : > { %2179 = vmatmul.mubr.bf16.gmra.mrb[80].mxu1 %v4875_v26  ;;  %2097 = vmatprep.mubr.bf16.mxu0 %v4956_v54  ;;  %v1151_v26 = vld [vmem:[#allocation2 + $0xe0] sm:$0xff] }
 0x178   : > { %4114 = vmatprep.mubr.msk.bf16.mxu1 %vm4903_vm11, %v4907_v40  ;;  %3803 = vmatpush3.bf16.msra.mxu0 %v4017_v42  ;;  %v1253_v39 = vpack.c.bf16 %v1151_v26, %v1150_v11 }
 0x179   : > { %3804 = vmatprep.subr.bf16.mxu0 %v4018_v4 }
 0x17c   : > { %3805 = vmatpush3.bf16.msra.mxu0 %v4018_v4 }
 0x17d   : > { %2675 = vmatprep.subr.bf16.mxu0 %v4036_v57 }
 0x17e   : > { %4117 = vmatmul.mubr.msk.bf16.gmra.mrb[88].mxu0 %vm4903_vm11, %v4907_v40  ;;  %v1183_v40 = vld [vmem:[#allocation2 + $0xe2] sm:$0xff] }
 0x17f   : > { %2187 = vmatmul.mubr.bf16.gmra.mrb[84].mxu1 %v4920_v7  ;;  %2105 = vmatprep.mubr.bf16.mxu0 %v4994_v32 }
 0x180   : > { %4120 = vmatprep.mubr.msk.bf16.mxu1 %vm4937_vm0, %v4941_v21 }
 0x186   : > { %4123 = vmatmul.mubr.msk.bf16.gmra.mrb[92].mxu0 %vm4937_vm0, %v4941_v21  ;;  %v4024_v21 = vld [vmem:[%s5681_s3 + $0x24] ss:$16 sps:$4 sm:$0xff]  }
 0x187   : > { %2195 = vmatmul.mubr.bf16.gmra.mrb[88].mxu1 %v4951_v50  ;;  %2113 = vmatprep.mubr.bf16.mxu0 %v5022_v63  ;;  %v4025_v50 = vld [vmem:[%s5681_s3 + $0x40] ss:$16 sps:$4 sm:$0xff]  }
 0x188   : > { %4126 = vmatprep.mubr.msk.bf16.mxu1 %vm4973_vm6, %v4977_v0 }
 0x18e   : > { %4129 = vmatmul.mubr.msk.bf16.gmra.mrb[96].mxu0 %vm4973_vm6, %v4977_v0  ;;  %v4033_v0 = vld [vmem:[%s5681_s3 + $0x84] ss:$16 sps:$4 sm:$0xff]  }
 0x18f   : > { %2203 = vmatmul.mubr.bf16.gmra.mrb[92].mxu1 %v4992_v29  ;;  %2121 = vmatprep.mubr.bf16.mxu0 %v1252_v46 }
 0x190   : > { %4132 = vmatprep.mubr.msk.bf16.mxu1 %vm4130_vm5, %v4131_v60 }
 0x196   : > { %4135 = vmatmul.mubr.msk.bf16.gmra.mrb[100].mxu0 %vm4130_vm5, %v4131_v60 }
 0x197   : > { %2211 = vmatmul.mubr.bf16.gmra.mrb[96].mxu1 %v5020_v56  ;;  %3806 = vmatprep.mubr.bf16.mxu0 %v4825_v51  ;;  %v1182_v51 = vld [vmem:[#allocation2 + $0xda] sm:$0xff] }
 0x198   : > { %4138 = vmatprep.mubr.msk.bf16.mxu1 %vm4136_vm14, %v4137_v62  ;;  %v1255_v7 = vpack.c.bf16 %v1183_v40, %v1182_v51 }
 0x19e   : > { %3807 = vmatmul.mubr.bf16.vlgmr.msra.gmra.mrb[104].mxu0 %v4881_v30  ;;  %v4021_v30 = vld [vmem:[%s5681_s3 + $0x4] ss:$16 sps:$4 sm:$0xff]  }
 0x19f   : > { %2219 = vmatmul.mubr.bf16.gmra.mrb[100].mxu1 %v1253_v39  ;;  %3810 = vmatprep.mubr.bf16.mxu0 %v4923_v12  ;;  %v4022_v12 = vld [vmem:[%s5681_s3 + $0x20] ss:$16 sps:$4 sm:$0xff]  }
 0x1a0   : > { %2562 = vmatprep.subr.bf16.mxu1 %v4021_v30  ;;  %2676 = vmatpush1.bf16.msra.mxu0 %v5150_v58 }
 0x1a1   : > { %2563 = vmatpush1.bf16.msra.mxu1 %v4019_v20  ;;  %2677 = vmatprep.subr.bf16.mxu0 %v5162_v5 }
 0x1a2   : > { %2564 = vmatprep.subr.bf16.mxu1 %v4024_v21  ;;  %2594 = vmatprep.mubr.bf16.mxu1 %v4237_v1 }
 0x1a4   : > { %2678 = vmatpush1.bf16.msra.mxu0 %v5167_v6 }
 0x1a5   : > { %2565 = vmatpush1.bf16.msra.mxu1 %v4022_v12  ;;  %2679 = vmatprep.subr.bf16.mxu0 %v5174_v8 }
 0x1a6   : > { %3811 = vmatmul.mubr.bf16.gmra.mrb[108].mxu0 %v4956_v54  ;;  %2566 = vmatprep.subr.bf16.mxu1 %v4027_v53  ;;  %v4028_v54 = vld [vmem:[%s5681_s3 + $0x60] ss:$16 sps:$4 sm:$0xff]  }
 0x1a7   : > { %3814 = vmatprep.mubr.bf16.mxu0 %v4994_v32 }
 0x1a8   : > { %2680 = vmatpush1.bf16.msra.mxu0 %v5179_v10 }
 0x1a9   : > { %2567 = vmatpush1.bf16.msra.mxu1 %v4025_v50  ;;  %2681 = vmatprep.subr.bf16.mxu0 %v5192_v15 }
 0x1aa   : > { %2568 = vmatprep.subr.bf16.mxu1 %v4030_v55 }
 0x1ac   : > { %2682 = vmatpush1.bf16.msra.mxu0 %v5197_v16 }
 0x1ad   : > { %2569 = vmatpush1.bf16.msra.mxu1 %v4028_v54  ;;  %2683 = vmatprep.subr.bf16.mxu0 %v5204_v17 }
 0x1ae   : > { %3815 = vmatmul.mubr.bf16.gmra.mrb[112].mxu0 %v5022_v63  ;;  %2570 = vmatprep.subr.bf16.mxu1 %v4033_v0 }
 0x1af   : > { %3818 = vmatprep.mubr.bf16.mxu0 %v1252_v46 }
 0x1b0   : > { %2684 = vmatpush1.bf16.msra.mxu0 %v5209_v22 }
 0x1b1   : > { %2571 = vmatpush1.bf16.msra.mxu1 %v4031_v59  ;;  %2685 = vmatprep.subr.bf16.mxu0 %v5222_v25 }
 0x1b2   : > { %2572 = vmatprep.subr.bf16.mxu1 %v4042_v14 }
 0x1b4   : > { %2686 = vmatpush1.bf16.msra.mxu0 %v5227_v27 }
 0x1b5   : > { %2573 = vmatpush1.bf16.msra.mxu1 %v4040_v13  ;;  %2687 = vmatprep.subr.bf16.mxu0 %v5234_v31 }
 0x1b6   : > { %3819 = vmatmul.mubr.bf16.gmra.mrb[116].mxu0 %v1255_v7  ;;  %2574 = vmatprep.subr.bf16.mxu1 %v4051_v24 }
 0x1b7   : > { %2707 = vmatprep.mubr.bf16.mxu0 %v4237_v1 }
 0x1b8   : > { %2688 = vmatpush1.bf16.msra.mxu0 %v5239_v35 }
 0x1b9   : > { %2575 = vmatpush1.bf16.msra.mxu1 %v4049_v23  ;;  %2689 = vmatprep.subr.bf16.mxu0 %v5252_v44 }
 0x1ba   : > { %2576 = vmatprep.subr.bf16.mxu1 %v4060_v61 }
 0x1bc   : > { %2690 = vmatpush1.bf16.msra.mxu0 %v5257_v45 }
 0x1bd   : > { %2577 = vmatpush1.bf16.msra.mxu1 %v4058_v38 }
 0x1be   : > { %3822 = vmatprep.subr.bf16.mxu1 %v4036_v57 }
 0x1f1   : > { %v3534_v28 = vpop.f32.mrb[40].mxu0 }
 0x1f2   : > { %v3535_v29 = vpop.f32.mrb[41].mxu0 }
 0x1f3   : > { %v3536_v32 = vadd.f32 %v3535_v29, %v3534_v28  ;;  %v3537_v33 = vpop.f32.mrb[42].mxu0 }
 0x1f4   : > { %v3538_v36 = vpop.f32.mrb[43].mxu0 }
 0x1f5   : > { %v3539_v37 = vadd.f32 %v3538_v36, %v3537_v33  ;;  %v1874_v2 = vadd.f32 %v3536_v32, %v5263_v47 }
 0x1f7   : > { %v1877_v4 = vadd.f32 %v3539_v37, %v5263_v47 }
 0x1f9   : > { %v3540_v48 = vpop.f32.mrb[44].mxu0 }
 0x1fa   : > { %v3598_v49 = vpop.f32.mrb[40].mxu1  ;;  %v3541_v52 = vpop.f32.mrb[45].mxu0 }
 0x1fb   : > { %v3542_v9 = vadd.f32 %v3541_v52, %v3540_v48  ;;  %v3599_v56 = vpop.f32.mrb[41].mxu1  ;;  %v3543_v63 = vpop.f32.mrb[46].mxu0 }
 0x1fc   : > { %v3600_v3 = vadd.f32 %v3599_v56, %v3598_v49  ;;  %v3601_v34 = vpop.f32.mrb[42].mxu1  ;;  %v3544_v43 = vpop.f32.mrb[47].mxu0 }
 0x1fd   : > { %v3545_v41 = vadd.f32 %v3544_v43, %v3543_v63  ;;  %v3602_v42 = vpop.f32.mrb[43].mxu1  ;;  %v1882_v40 = vadd.f32 %v3542_v9, %v5263_v47 }
 0x1fe   : > { %v5270_v18 = vadd.f32 %v3600_v3, %v1874_v2  ;;  %v3603_v19 = vadd.f32 %v3602_v42, %v3601_v34 }
 0x1ff   : > { %v1885_v50 = vadd.f32 %v3545_v41, %v5263_v47 }
 0x200   : > { %v5272_v46 = vadd.f32 %v3603_v19, %v1877_v4 }
 0x201   : > { %v3546_v60 = vpop.f32.mrb[48].mxu0 }
 0x202   : > { %v3604_v62 = vpop.f32.mrb[44].mxu1  ;;  %v3547_v11 = vpop.f32.mrb[49].mxu0 }
 0x203   : > { %v3548_v26 = vadd.f32 %v3547_v11, %v3546_v60  ;;  %v3605_v39 = vpop.f32.mrb[45].mxu1  ;;  %v3549_v51 = vpop.f32.mrb[50].mxu0 }
 0x204   : > { %v3606_v7 = vadd.f32 %v3605_v39, %v3604_v62  ;;  %v3607_v20 = vpop.f32.mrb[46].mxu1  ;;  %v3550_v30 = vpop.f32.mrb[51].mxu0 }
 0x205   : > { %v3551_v12 = vadd.f32 %v3550_v30, %v3549_v51  ;;  %v3608_v21 = vpop.f32.mrb[47].mxu1  ;;  %v1890_v24 = vadd.f32 %v3548_v26, %v5263_v47 }
 0x206   : > { %v5276_v53 = vadd.f32 %v3606_v7, %v1882_v40  ;;  %v3609_v54 = vadd.f32 %v3608_v21, %v3607_v20 }
 0x207   : > { %v1893_v37 = vadd.f32 %v3551_v12, %v5263_v47 }
 0x208   : > { %v5278_v55 = vadd.f32 %v3609_v54, %v1885_v50 }
 0x209   : > { %v3552_v57 = vpop.f32.mrb[52].mxu0 }
 0x20a   : > { %v3610_v59 = vpop.f32.mrb[48].mxu1  ;;  %v3553_v0 = vpop.f32.mrb[53].mxu0 }
 0x20b   : > { %v3554_v13 = vadd.f32 %v3553_v0, %v3552_v57  ;;  %v3611_v14 = vpop.f32.mrb[49].mxu1  ;;  %v3555_v23 = vpop.f32.mrb[54].mxu0 }
 0x20c   : > { %v3612_v28 = vadd.f32 %v3611_v14, %v3610_v59  ;;  %v3613_v29 = vpop.f32.mrb[50].mxu1  ;;  %v3556_v32 = vpop.f32.mrb[55].mxu0 }
 0x20d   : > { %v3557_v33 = vadd.f32 %v3556_v32, %v3555_v23  ;;  %v3614_v36 = vpop.f32.mrb[51].mxu1  ;;  %v1898_v3 = vadd.f32 %v3554_v13, %v5263_v47 }
 0x20e   : > { %v5282_v38 = vadd.f32 %v3612_v28, %v1890_v24  ;;  %v3615_v61 = vadd.f32 %v3614_v36, %v3613_v29 }
 0x20f   : > { %v1901_v19 = vadd.f32 %v3557_v33, %v5263_v47 }
 0x210   : > { %v5284_v48 = vadd.f32 %v3615_v61, %v1893_v37 }
 0x211   : > { %v3558_v49 = vpop.f32.mrb[56].mxu0 }
 0x212   : > { %v3616_v52 = vpop.f32.mrb[52].mxu1  ;;  %v3559_v9 = vpop.f32.mrb[57].mxu0 }
 0x213   : > { %v3560_v56 = vadd.f32 %v3559_v9, %v3558_v49  ;;  %v3617_v63 = vpop.f32.mrb[53].mxu1  ;;  %v3561_v2 = vpop.f32.mrb[58].mxu0 }
 0x214   : > { %v3618_v34 = vadd.f32 %v3617_v63, %v3616_v52  ;;  %v3619_v43 = vpop.f32.mrb[54].mxu1  ;;  %v3562_v41 = vpop.f32.mrb[59].mxu0 }
 0x215   : > { %v3563_v42 = vadd.f32 %v3562_v41, %v3561_v2  ;;  %v3620_v4 = vpop.f32.mrb[55].mxu1  ;;  %v1906_v30 = vadd.f32 %v3560_v56, %v5263_v47 }
 0x216   : > { %v5288_v60 = vadd.f32 %v3618_v34, %v1898_v3  ;;  %v3621_v62 = vadd.f32 %v3620_v4, %v3619_v43 }
 0x217   : > { %v1909_v59 = vadd.f32 %v3563_v42, %v5263_v47 }
 0x218   : > { %v5290_v11 = vadd.f32 %v3621_v62, %v1901_v19 }
 0x219   : > { %v3564_v26 = vpop.f32.mrb[60].mxu0 }
 0x21a   : > { %v3622_v39 = vpop.f32.mrb[56].mxu1  ;;  %v3565_v51 = vpop.f32.mrb[61].mxu0 }
 0x21b   : > { %v3566_v40 = vadd.f32 %v3565_v51, %v3564_v26  ;;  %v3623_v7 = vpop.f32.mrb[57].mxu1  ;;  %v3567_v20 = vpop.f32.mrb[62].mxu0 }
 0x21c   : > { %v3624_v12 = vadd.f32 %v3623_v7, %v3622_v39  ;;  %v3625_v21 = vpop.f32.mrb[58].mxu1  ;;  %v3568_v50 = vpop.f32.mrb[63].mxu0 }
 0x21d   : > { %v3569_v54 = vadd.f32 %v3568_v50, %v3567_v20  ;;  %v3626_v57 = vpop.f32.mrb[59].mxu1  ;;  %v1914_v36 = vadd.f32 %v3566_v40, %v5263_v47 }
 0x21e   : > { %v5294_v0 = vadd.f32 %v3624_v12, %v1906_v30  ;;  %v3627_v13 = vadd.f32 %v3626_v57, %v3625_v21 }
 0x21f   : > { %v1917_v56 = vadd.f32 %v3569_v54, %v5263_v47 }
 0x220   : > { %v5296_v14 = vadd.f32 %v3627_v13, %v1909_v59 }
 0x221   : > { %v3570_v23 = vpop.f32.mrb[64].mxu0 }
 0x222   : > { %v3628_v24 = vpop.f32.mrb[60].mxu1  ;;  %v3571_v28 = vpop.f32.mrb[65].mxu0 }
 0x223   : > { %v3572_v29 = vadd.f32 %v3571_v28, %v3570_v23  ;;  %v3629_v32 = vpop.f32.mrb[61].mxu1  ;;  %v3573_v33 = vpop.f32.mrb[66].mxu0 }
 0x224   : > { %v3630_v37 = vadd.f32 %v3629_v32, %v3628_v24  ;;  %v3631_v61 = vpop.f32.mrb[62].mxu1  ;;  %v3574_v49 = vpop.f32.mrb[67].mxu0 }
 0x225   : > { %v3575_v52 = vadd.f32 %v3574_v49, %v3573_v33  ;;  %v3632_v9 = vpop.f32.mrb[63].mxu1  ;;  %v1922_v62 = vadd.f32 %v3572_v29, %v5263_v47 }
 0x226   : > { %v5300_v63 = vadd.f32 %v3630_v37, %v1914_v36  ;;  %v3633_v2 = vadd.f32 %v3632_v9, %v3631_v61 }
 0x227   : > { %v1925_v20 = vadd.f32 %v3575_v52, %v5263_v47 }
 0x228   : > { %v5302_v3 = vadd.f32 %v3633_v2, %v1917_v56 }
 0x229   : > { %v3576_v34 = vpop.f32.mrb[68].mxu0 }
 0x22a   : > { %v3634_v43 = vpop.f32.mrb[64].mxu1  ;;  %v3577_v41 = vpop.f32.mrb[69].mxu0 }
 0x22b   : > { %v3578_v42 = vadd.f32 %v3577_v41, %v3576_v34  ;;  %v3635_v4 = vpop.f32.mrb[65].mxu1  ;;  %v3579_v19 = vpop.f32.mrb[70].mxu0 }
 0x22c   : > { %v3636_v26 = vadd.f32 %v3635_v4, %v3634_v43  ;;  %v3637_v39 = vpop.f32.mrb[66].mxu1  ;;  %v3580_v51 = vpop.f32.mrb[71].mxu0 }
 0x22d   : > { %v3581_v40 = vadd.f32 %v3580_v51, %v3579_v19  ;;  %v3638_v7 = vpop.f32.mrb[67].mxu1  ;;  %v1930_v24 = vadd.f32 %v3578_v42, %v5263_v47 }
 0x22e   : > { %v5306_v30 = vadd.f32 %v3636_v26, %v1922_v62  ;;  %v3639_v12 = vadd.f32 %v3638_v7, %v3637_v39 }
 0x22f   : > { %v1933_v61 = vadd.f32 %v3581_v40, %v5263_v47 }
 0x230   : > { %v5308_v21 = vadd.f32 %v3639_v12, %v1925_v20 }
 0x231   : > { %v3662_v50 = vpop.f32.mrb[72].mxu0 }
 0x232   : > { %v3640_v54 = vpop.f32.mrb[68].mxu1  ;;  %v3663_v57 = vpop.f32.mrb[73].mxu0 }
 0x233   : > { %v3641_v59 = vpop.f32.mrb[69].mxu1  ;;  %v3664_v13 = vadd.f32 %v3663_v57, %v3662_v50  ;;  %v3665_v23 = vpop.f32.mrb[74].mxu0 }
 0x234   : > { %v3642_v28 = vadd.f32 %v3641_v59, %v3640_v54  ;;  %v3643_v29 = vpop.f32.mrb[70].mxu1  ;;  %v3666_v32 = vpop.f32.mrb[75].mxu0 }
 0x235   : > { %v2068_v33 = vadd.f32 %v3664_v13, %v5270_v18  ;;  %v3644_v36 = vpop.f32.mrb[71].mxu1  ;;  %v3667_v37 = vadd.f32 %v3666_v32, %v3665_v23 }
 0x236   : > { %v5313_v49 = vadd.f32 %v3642_v28, %v1930_v24  ;;  %v3645_v52 = vadd.f32 %v3644_v36, %v3643_v29 }
 0x237   : > { %v2071_v9 = vadd.f32 %v3667_v37, %v5272_v46 }
 0x238   : > { %v5316_v56 = vadd.f32 %v3645_v52, %v1933_v61 }
 0x239   : > { %v3668_v2 = vpop.f32.mrb[76].mxu0 }
 0x23a   : > { %v3726_v34 = vpop.f32.mrb[72].mxu1  ;;  %v3669_v43 = vpop.f32.mrb[77].mxu0 }
 0x23b   : > { %v3670_v41 = vadd.f32 %v3669_v43, %v3668_v2  ;;  %v3727_v42 = vpop.f32.mrb[73].mxu1  ;;  %v3671_v4 = vpop.f32.mrb[78].mxu0 }
 0x23c   : > { %v3728_v19 = vadd.f32 %v3727_v42, %v3726_v34  ;;  %v3729_v62 = vpop.f32.mrb[74].mxu1  ;;  %v3672_v18 = vpop.f32.mrb[79].mxu0 }
 0x23d   : > { %v2076_v26 = vadd.f32 %v3670_v41, %v5276_v53  ;;  %v3673_v39 = vadd.f32 %v3672_v18, %v3671_v4  ;;  %v3730_v47 = vpop.f32.mrb[75].mxu1 }
 0x23e   : > { %v3731_v51 = vadd.f32 %v3730_v47, %v3729_v62  ;;  %v5319_v40 = vadd.f32 %v3728_v19, %v2068_v33 }
 0x23f   : > { %v2079_v46 = vadd.f32 %v3673_v39, %v5278_v55 }
 0x240   : > { %v5322_v7 = vadd.f32 %v3731_v51, %v2071_v9 }
 0x241   : > { %v3674_v20 = vpop.f32.mrb[80].mxu0 }
 0x242   : > { %v3732_v12 = vpop.f32.mrb[76].mxu1  ;;  %v3675_v50 = vpop.f32.mrb[81].mxu0 }
 0x243   : > { %v3676_v54 = vadd.f32 %v3675_v50, %v3674_v20  ;;  %v3733_v57 = vpop.f32.mrb[77].mxu1  ;;  %v3677_v59 = vpop.f32.mrb[82].mxu0 }
 0x244   : > { %v3734_v13 = vadd.f32 %v3733_v57, %v3732_v12  ;;  %v3735_v23 = vpop.f32.mrb[78].mxu1  ;;  %v3678_v24 = vpop.f32.mrb[83].mxu0 }
 0x245   : > { %v2084_v53 = vadd.f32 %v3676_v54, %v5282_v38  ;;  %v3679_v28 = vadd.f32 %v3678_v24, %v3677_v59  ;;  %v3736_v29 = vpop.f32.mrb[79].mxu1 }
 0x246   : > { %v3737_v32 = vadd.f32 %v3736_v29, %v3735_v23  ;;  %v5325_v33 = vadd.f32 %v3734_v13, %v2076_v26 }
 0x247   : > { %v2087_v55 = vadd.f32 %v3679_v28, %v5284_v48 }
 0x248   : > { %v5328_v36 = vadd.f32 %v3737_v32, %v2079_v46 }
 0x249   : > { %v3680_v37 = vpop.f32.mrb[84].mxu0 }
 0x24a   : > { %v3738_v61 = vpop.f32.mrb[80].mxu1  ;;  %v3681_v52 = vpop.f32.mrb[85].mxu0 }
 0x24b   : > { %v3682_v9 = vadd.f32 %v3681_v52, %v3680_v37  ;;  %v3739_v2 = vpop.f32.mrb[81].mxu1  ;;  %v3683_v34 = vpop.f32.mrb[86].mxu0 }
 0x24c   : > { %v3740_v43 = vadd.f32 %v3739_v2, %v3738_v61  ;;  %v3741_v41 = vpop.f32.mrb[82].mxu1  ;;  %v3684_v42 = vpop.f32.mrb[87].mxu0 }
 0x24d   : > { %v2092_v38 = vadd.f32 %v3682_v9, %v5288_v60  ;;  %v3685_v4 = vadd.f32 %v3684_v42, %v3683_v34  ;;  %v3742_v19 = vpop.f32.mrb[83].mxu1 }
 0x24e   : > { %v3743_v62 = vadd.f32 %v3742_v19, %v3741_v41  ;;  %v5331_v18 = vadd.f32 %v3740_v43, %v2084_v53 }
 0x24f   : > { %v2095_v48 = vadd.f32 %v3685_v4, %v5290_v11 }
 0x250   : > { %v5334_v26 = vadd.f32 %v3743_v62, %v2087_v55 }
 0x251   : > { %v3686_v39 = vpop.f32.mrb[88].mxu0 }
 0x252   : > { %v3744_v47 = vpop.f32.mrb[84].mxu1  ;;  %v3687_v51 = vpop.f32.mrb[89].mxu0 }
 0x253   : > { %v3688_v46 = vadd.f32 %v3687_v51, %v3686_v39  ;;  %v3745_v20 = vpop.f32.mrb[85].mxu1  ;;  %v3689_v12 = vpop.f32.mrb[90].mxu0 }
 0x254   : > { %v3746_v50 = vadd.f32 %v3745_v20, %v3744_v47  ;;  %v3747_v54 = vpop.f32.mrb[86].mxu1  ;;  %v3690_v57 = vpop.f32.mrb[91].mxu0 }
 0x255   : > { %v2100_v60 = vadd.f32 %v3688_v46, %v5294_v0  ;;  %v3691_v59 = vadd.f32 %v3690_v57, %v3689_v12  ;;  %v3748_v13 = vpop.f32.mrb[87].mxu1 }
 0x256   : > { %v3749_v23 = vadd.f32 %v3748_v13, %v3747_v54  ;;  %v5337_v24 = vadd.f32 %v3746_v50, %v2092_v38 }
 0x257   : > { %v2103_v11 = vadd.f32 %v3691_v59, %v5296_v14 }
 0x258   : > { %v5340_v53 = vadd.f32 %v3749_v23, %v2095_v48 }
 0x259   : > { %v3692_v28 = vpop.f32.mrb[92].mxu0 }
 0x25a   : > { %v3750_v29 = vpop.f32.mrb[88].mxu1  ;;  %v3693_v32 = vpop.f32.mrb[93].mxu0 }
 0x25b   : > { %v3694_v55 = vadd.f32 %v3693_v32, %v3692_v28  ;;  %v3751_v37 = vpop.f32.mrb[89].mxu1  ;;  %v3695_v61 = vpop.f32.mrb[94].mxu0 }
 0x25c   : > { %v3752_v52 = vadd.f32 %v3751_v37, %v3750_v29  ;;  %v3753_v9 = vpop.f32.mrb[90].mxu1  ;;  %v3696_v2 = vpop.f32.mrb[95].mxu0 }
 0x25d   : > { %v2108_v0 = vadd.f32 %v3694_v55, %v5300_v63  ;;  %v3697_v34 = vadd.f32 %v3696_v2, %v3695_v61  ;;  %v3754_v43 = vpop.f32.mrb[91].mxu1 }
 0x25e   : > { %v3755_v41 = vadd.f32 %v3754_v43, %v3753_v9  ;;  %v5343_v42 = vadd.f32 %v3752_v52, %v2100_v60 }
 0x25f   : > { %v2111_v14 = vadd.f32 %v3697_v34, %v5302_v3 }
 0x260   : > { %v5346_v38 = vadd.f32 %v3755_v41, %v2103_v11 }
 0x261   : > { %v3698_v4 = vpop.f32.mrb[96].mxu0 }
 0x262   : > { %v3756_v19 = vpop.f32.mrb[92].mxu1  ;;  %v3699_v62 = vpop.f32.mrb[97].mxu0 }
 0x263   : > { %v3700_v48 = vadd.f32 %v3699_v62, %v3698_v4  ;;  %v3757_v39 = vpop.f32.mrb[93].mxu1  ;;  %v3701_v47 = vpop.f32.mrb[98].mxu0 }
 0x264   : > { %v3758_v51 = vadd.f32 %v3757_v39, %v3756_v19  ;;  %v3759_v46 = vpop.f32.mrb[94].mxu1  ;;  %v3702_v20 = vpop.f32.mrb[99].mxu0 }
 0x265   : > { %v2116_v63 = vadd.f32 %v3700_v48, %v5306_v30  ;;  %v3703_v12 = vadd.f32 %v3702_v20, %v3701_v47  ;;  %v3760_v50 = vpop.f32.mrb[95].mxu1 }
 0x266   : > { %v3761_v54 = vadd.f32 %v3760_v50, %v3759_v46  ;;  %v5349_v57 = vadd.f32 %v3758_v51, %v2108_v0 }
 0x267   : > { %v2119_v3 = vadd.f32 %v3703_v12, %v5308_v21 }
 0x268   : > { %v5352_v60 = vadd.f32 %v3761_v54, %v2111_v14 }
 0x269   : > { %v3704_v59 = vpop.f32.mrb[100].mxu0 }
 0x26a   : > { %v3762_v13 = vpop.f32.mrb[96].mxu1  ;;  %v3705_v23 = vpop.f32.mrb[101].mxu0 }
 0x26b   : > { %v3706_v11 = vadd.f32 %v3705_v23, %v3704_v59  ;;  %v3763_v28 = vpop.f32.mrb[97].mxu1  ;;  %v3707_v29 = vpop.f32.mrb[102].mxu0 }
 0x26c   : > { %v3764_v32 = vadd.f32 %v3763_v28, %v3762_v13  ;;  %v3765_v55 = vpop.f32.mrb[98].mxu1  ;;  %v3708_v37 = vpop.f32.mrb[103].mxu0 }
 0x26d   : > { %v2124_v30 = vadd.f32 %v3706_v11, %v5313_v49  ;;  %v3709_v61 = vadd.f32 %v3708_v37, %v3707_v29  ;;  %v3766_v52 = vpop.f32.mrb[99].mxu1 }
 0x26e   : > { %v3767_v9 = vadd.f32 %v3766_v52, %v3765_v55  ;;  %v5355_v2 = vadd.f32 %v3764_v32, %v2116_v63 }
 0x26f   : > { %v2127_v21 = vadd.f32 %v3709_v61, %v5316_v56 }
 0x270   : > { %v5358_v0 = vadd.f32 %v3767_v9, %v2119_v3 }
 0x271   : > { %v3808_v34 = vpop.f32.mrb[104].mxu0 }
 0x272   : > { %v3768_v43 = vpop.f32.mrb[100].mxu1  ;;  %v2270_v41 = vadd.f32 %v3808_v34, %v5325_v33  ;;  %v2261_v14 = vpop.f32.mrb[105].mxu0 }
 0x273   : > { %v3769_v4 = vpop.f32.mrb[101].mxu1  ;;  %v2262_v19 = vadd.f32 %v2261_v14, %v5319_v40  ;;  %v3809_v62 = vpop.f32.mrb[106].mxu0 }
 0x274   : > { %v3770_v48 = vadd.f32 %v3769_v4, %v3768_v43  ;;  %v3771_v49 = vpop.f32.mrb[102].mxu1  ;;  %v2273_v39 = vadd.f32 %v3809_v62, %v5328_v36  ;;  %v2264_v47 = vpop.f32.mrb[107].mxu0  ;;  %v2326_v56 = vmax.f32 %v2270_v41, 0.0 }
 0x275   : > { %v3772_v51 = vpop.f32.mrb[103].mxu1  ;;  %v2265_v46 = vadd.f32 %v2264_v47, %v5322_v7  ;;  %v2324_v50 = vmax.f32 %v2262_v19, 0.0 }
 0x276   : > { %v2327_v20 = vmax.f32 %v2273_v39, 0.0  ;;  %v3773_v63 = vadd.f32 %v3772_v51, %v3771_v49  ;;  %v2221_v12 = vadd.f32 %v3770_v48, %v2124_v30 }
 0x277   : > { %v2325_v54 = vmax.f32 %v2265_v46, 0.0  ;;  %v3294_v46 = vld [vmem:[%s4449_s16 + $0x40] sm:$0xff] }
 0x278   : > { %v2341_v33 = vpack.c.bf16 %v2327_v20, %v2326_v56  ;;  %v2224_v3 = vadd.f32 %v3773_v63, %v2127_v21  ;;  %v3296_v20 = vld [vmem:[%s4449_s16 + $0x50] sm:$0xff] }
 0x279   : > { %v2340_v59 = vpack.c.bf16 %v2325_v54, %v2324_v50  ;;  %v3812_v13 = vpop.f32.mrb[108].mxu0  ;;  %v3295_v54 = vld [vmem:[%s4449_s16 + $0x48] sm:$0xff] }
 0x27a   : > { %v2286_v40 = vadd.f32 %v3812_v13, %v5337_v24  ;;  %v2277_v23 = vpop.f32.mrb[109].mxu0 }
 0x27b   : > { %v2278_v11 = vadd.f32 %v2277_v23, %v5331_v18  ;;  %v3813_v36 = vpop.f32.mrb[110].mxu0  ;;  %2595 = vmatmul.mubr.bf16.vlgmr.msra.gmra.mrb[104].mxu1 %v2340_v59  ;;  %2708 = vmatmul.mubr.bf16.vlgmr.msra.gmra.mrb[120].mxu0 %v2340_v59  ;;  %v3298_v23 = vld [vmem:[%s4449_s16 + $0x60] sm:$0xff] }
 0x27c   : > { %v2289_v7 = vadd.f32 %v3813_v36, %v5340_v53  ;;  %3830 = vmatpush1.bf16.msra.mxu1 %v5150_v58  ;;  %v2280_v28 = vpop.f32.mrb[111].mxu0  ;;  %2604 = vmatprep.mubr.bf16.mxu1 %v4237_v1  ;;  %v2330_v24 = vmax.f32 %v2286_v40, 0.0  ;;  %v3300_v36 = vld [vmem:[%s4449_s16 + $0x70] sm:$0xff] }
 0x27d   : > { %v2281_v29 = vadd.f32 %v2280_v28, %v5334_v26  ;;  %3823 = vmatprep.subr.bf16.mxu1 %v5162_v5  ;;  %2717 = vmatprep.mubr.bf16.mxu0 %v4237_v1  ;;  %v2328_v55 = vmax.f32 %v2278_v11, 0.0 }
 0x27e   : > { %v2331_v32 = vmax.f32 %v2289_v7, 0.0 }
 0x27f   : > { %v2329_v18 = vmax.f32 %v2281_v29, 0.0 }
 0x280   : > { %v2343_v37 = vpack.c.bf16 %v2331_v32, %v2330_v24  ;;  %3831 = vmatpush1.bf16.msra.mxu1 %v5167_v6 }
 0x281   : > { %v2342_v30 = vpack.c.bf16 %v2329_v18, %v2328_v55  ;;  %v3816_v53 = vpop.f32.mrb[112].mxu0  ;;  %3824 = vmatprep.subr.bf16.mxu1 %v5174_v8  ;;  %v3299_v55 = vld [vmem:[%s4449_s16 + $0x68] sm:$0xff] }
 0x282   : > { %v2302_v58 = vadd.f32 %v3816_v53, %v5349_v57  ;;  %v2293_v61 = vpop.f32.mrb[113].mxu0 }
 0x283   : > { %v2294_v26 = vadd.f32 %v2293_v61, %v5343_v42  ;;  %v3817_v52 = vpop.f32.mrb[114].mxu0  ;;  %2605 = vmatmul.mubr.bf16.gmra.mrb[108].mxu1 %v2341_v33  ;;  %2718 = vmatmul.mubr.bf16.gmra.mrb[124].mxu0 %v2341_v33 }
 0x284   : > { %v2305_v5 = vadd.f32 %v3817_v52, %v5352_v60  ;;  %v2296_v9 = vpop.f32.mrb[115].mxu0  ;;  %2614 = vmatprep.mubr.bf16.mxu1 %v4237_v1  ;;  %2727 = vmatprep.mubr.bf16.mxu0 %v4237_v1  ;;  %v2334_v8 = vmax.f32 %v2302_v58, 0.0 }
 0x285   : > { %v2297_v6 = vadd.f32 %v2296_v9, %v5346_v38  ;;  %3832 = vmatpush1.bf16.msra.mxu1 %v5179_v10  ;;  %v2332_v57 = vmax.f32 %v2294_v26, 0.0 }
 0x286   : > { %v2335_v21 = vmax.f32 %v2305_v5, 0.0  ;;  %3825 = vmatprep.subr.bf16.mxu1 %v5192_v15 }
 0x287   : > { %v2333_v42 = vmax.f32 %v2297_v6, 0.0 }
 0x288   : > { %v2345_v34 = vpack.c.bf16 %v2335_v21, %v2334_v8 }
 0x289   : > { %v2344_v43 = vpack.c.bf16 %v2333_v42, %v2332_v57  ;;  %v3820_v41 = vpop.f32.mrb[116].mxu0  ;;  %3833 = vmatpush1.bf16.msra.mxu1 %v5197_v16 }
 0x28a   : > { %v2318_v60 = vadd.f32 %v3820_v41, %v2221_v12  ;;  %v2309_v14 = vpop.f32.mrb[117].mxu0  ;;  %3826 = vmatprep.subr.bf16.mxu1 %v5204_v17 }
 0x28b   : > { %v2310_v4 = vadd.f32 %v2309_v14, %v5355_v2  ;;  %v3821_v38 = vpop.f32.mrb[118].mxu0  ;;  %2615 = vmatmul.mubr.bf16.gmra.mrb[112].mxu1 %v2342_v30  ;;  %2728 = vmatmul.mubr.bf16.gmra.mrb[128].mxu0 %v2342_v30  ;;  %v3302_v14 = vld [vmem:[%s4449_s16 + $0x80] sm:$0xff] }
 0x28c   : > { %v2321_v10 = vadd.f32 %v3821_v38, %v2224_v3  ;;  %v2312_v19 = vpop.f32.mrb[119].mxu0  ;;  %2624 = vmatprep.mubr.bf16.mxu1 %v4237_v1  ;;  %2737 = vmatprep.mubr.bf16.mxu0 %v4237_v1  ;;  %v2338_v16 = vmax.f32 %v2318_v60, 0.0  ;;  %v3297_v3 = vld [vmem:[%s4449_s16 + $0x58] sm:$0xff]  ;;  %v3304_v38 = vld [vmem:[%s4449_s16 + $0x90] sm:$0xff] }
 0x28d   : > { %v2313_v15 = vadd.f32 %v2312_v19, %v5358_v0  ;;  %3834 = vmatpush1.bf16.msra.mxu1 %v5209_v22  ;;  %v2336_v17 = vmax.f32 %v2310_v4, 0.0  ;;  %v2382_v22 = vlaneseq }
 0x28e   : > { %v2339_v62 = vmax.f32 %v2321_v10, 0.0  ;;  %3827 = vmatprep.subr.bf16.mxu1 %v5222_v25 }
 0x28f   : > { %v2337_v48 = vmax.f32 %v2313_v15, 0.0  ;;  %v2383_v25 = vshrl.u32 %v2382_v22, 7  ;;  %v3306_v22 = vld [vmem:[%s4449_s16 + $0xa0] sm:$0xff] }
 0x290   : > { %v2347_v2 = vpack.c.bf16 %v2339_v62, %v2338_v16  ;;  %v3303_v16 = vld [vmem:[%s4449_s16 + $0x88] sm:$0xff] }
 0x291   : > { %v2346_v49 = vpack.c.bf16 %v2337_v48, %v2336_v17  ;;  %3835 = vmatpush1.bf16.msra.mxu1 %v5227_v27  ;;  %v2384_v27 = vsub.s32 0, %v2383_v25  ;;  %v3305_v17 = vld [vmem:[%s4449_s16 + $0x98] sm:$0xff] }
 0x292   : > { %3828 = vmatprep.subr.bf16.mxu1 %v5234_v31  ;;  %v2392_v31 = vsub.s32 2, %v2383_v25 }
 0x293   : > { %2625 = vmatmul.mubr.bf16.gmra.mrb[116].mxu1 %v2343_v37  ;;  %2738 = vmatmul.mubr.bf16.gmra.mrb[132].mxu0 %v2343_v37  ;;  %v3301_v37 = vld [vmem:[%s4449_s16 + $0x78] sm:$0xff] }
 0x294   : > { %2634 = vmatprep.mubr.bf16.mxu1 %v4237_v1  ;;  %2747 = vmatprep.mubr.bf16.mxu0 %v4237_v1 }
 0x295   : > { %3836 = vmatpush1.bf16.msra.mxu1 %v5239_v35  ;;  %v2380_v35 = vld [vmem:[%s5684_s6] sm:$0xf] }
 0x296   : > { %3829 = vmatprep.subr.bf16.mxu1 %v5252_v44  ;;  %v2388_v44 = vsub.s32 1, %v2383_v25  ;;  %v5406_v0 = vrot.slane %v2380_v35, %v2384_v27  ;;  %v5408_v39 = vrot.slane %v2380_v35, %v2392_v31  ;;  %v3308_v27 = vld [vmem:[%s4449_s16 + $0xb0] sm:$0xff] }
 0x299   : > { %3837 = vmatpush1.bf16.msra.mxu1 %v5257_v45  ;;  %v2396_v45 = vsub.s32 3, %v2383_v25 }
 0x29b   : > { %2635 = vmatmul.mubr.bf16.gmra.mrb[120].mxu1 %v2344_v43  ;;  %2748 = vmatmul.mubr.bf16.gmra.mrb[136].mxu0 %v2344_v43  ;;  %v5413_v47 = vrot.slane %v2380_v35, %v2396_v45 }
 0x29c   : > { %2644 = vmatprep.mubr.bf16.mxu1 %v4237_v1  ;;  %2757 = vmatprep.mubr.bf16.mxu0 %v4237_v1 }
 0x2a3   : > { %2645 = vmatmul.mubr.bf16.gmra.mrb[124].mxu1 %v2345_v34  ;;  %2758 = vmatmul.mubr.bf16.gmra.mrb[140].mxu0 %v2345_v34 }
 0x2a4   : > { %2654 = vmatprep.mubr.bf16.mxu1 %v4237_v1 }
 0x2ab   : > { %2655 = vmatmul.mubr.bf16.gmra.mrb[128].mxu1 %v2346_v49 }
 0x2ac   : > { %2664 = vmatprep.mubr.bf16.mxu1 %v4237_v1 }
 0x2b3   : > { %2665 = vmatmul.mubr.bf16.gmra.mrb[132].mxu1 %v2347_v2 }
 0x2b4   : > { %2767 = vmatprep.mubr.bf16.mxu1 %v4237_v1 }
 0x2bb   : > { %2768 = vmatmul.mubr.bf16.vlgmr.msra.gmra.mrb[136].mxu1 %v2346_v49 }
 0x2bc   : > { %2777 = vmatprep.mubr.bf16.mxu1 %v4237_v1  ;;  %v5411_v1 = vrot.slane %v2380_v35, %v2388_v44 }
 0x2c3   : > { %2778 = vmatmul.mubr.bf16.gmra.mrb[140].mxu1 %v2347_v2 }
 0x34e   : > { %v2596_v51 = vpop.f32.mrb[104].mxu1  ;;  %v2709_v56 = vpop.f32.mrb[120].mxu0 }
 0x34f   : > { %v2597_v63 = vadd.f32 %v2596_v51, %v5406_v0  ;;  %v2710_v12 = vadd.f32 %v2709_v56, %v5408_v39  ;;  %v2598_v50 = vpop.f32.mrb[105].mxu1  ;;  %v2711_v33 = vpop.f32.mrb[121].mxu0 }
 0x350   : > { %v2599_v59 = vadd.f32 %v2598_v50, %v5411_v1  ;;  %v2712_v13 = vadd.f32 %v2711_v33, %v5413_v47  ;;  %v2600_v40 = vpop.f32.mrb[106].mxu1  ;;  %v2713_v11 = vpop.f32.mrb[122].mxu0 }
 0x351   : > { %v2853_v7 = vadd.f32 %v3294_v46, %v2597_v63  ;;  %v2855_v28 = vadd.f32 %v3296_v20, %v2710_v12  ;;  %v2601_v29 = vadd.f32 %v2600_v40, %v5406_v0  ;;  %v2714_v24 = vadd.f32 %v2713_v11, %v5408_v39  ;;  %v2602_v32 = vpop.f32.mrb[107].mxu1  ;;  %v2715_v18 = vpop.f32.mrb[123].mxu0  ;;  %v3307_v46 = vld [vmem:[%s4449_s16 + $0xa8] sm:$0xff]  ;;  %v3309_v20 = vld [vmem:[%s4449_s16 + $0xb8] sm:$0xff] }
 0x352   : > { %v2854_v30 = vadd.f32 %v3295_v54, %v2599_v59  ;;  %v2856_v53 = vadd.f32 %v3297_v3, %v2712_v13  ;;  %v2603_v58 = vadd.f32 %v2602_v32, %v5411_v1  ;;  %v2716_v61 = vadd.f32 %v2715_v18, %v5413_v47 }
 0x353   : > { %v2917_v26 = vmax.f32 %v2853_v7, 0.0  ;;  %v2919_v52 = vmax.f32 %v2855_v28, 0.0  ;;  %v2857_v5 = vadd.f32 %v3298_v23, %v2601_v29  ;;  %v2859_v9 = vadd.f32 %v3300_v36, %v2714_v24 }
 0x354   : > { %v2918_v6 = vmax.f32 %v2854_v30, 0.0  ;;  %v2920_v8 = vmax.f32 %v2856_v53, 0.0  ;;  %v2858_v21 = vadd.f32 %v3299_v55, %v2603_v58  ;;  %v2860_v57 = vadd.f32 %v3301_v37, %v2716_v61  ;;  %v3310_v55 = vld [vmem:[%s4449_s16 + $0xc0] sm:$0xff]  ;;  %v3312_v37 = vld [vmem:[%s4449_s16 + $0xd0] sm:$0xff]  ;;  %v3311_v61 = vld [vmem:[%s4449_s16 + $0xc8] sm:$0xff] }
 0x355   : > { %2981 = vst [vmem:[%s5436_s20] sm:$0xff] %v2917_v26  ;;  %2983 = vst [vmem:[%s5436_s20 + $0x10] sm:$0xff] %v2919_v52  ;;  %v2921_v42 = vmax.f32 %v2857_v5, 0.0  ;;  %v2923_v34 = vmax.f32 %v2859_v9, 0.0  ;;  %v3313_v52 = vld [vmem:[%s4449_s16 + $0xd8] sm:$0xff] }
 0x356   : > { %2982 = vst [vmem:[%s5436_s20 + $0x8] sm:$0xff] %v2918_v6  ;;  %2984 = vst [vmem:[%s5436_s20 + $0x18] sm:$0xff] %v2920_v8  ;;  %v2922_v43 = vmax.f32 %v2858_v21, 0.0  ;;  %v2924_v41 = vmax.f32 %v2860_v57, 0.0  ;;  %v2606_v60 = vpop.f32.mrb[108].mxu1  ;;  %v2719_v4 = vpop.f32.mrb[124].mxu0 }
 0x357   : > { %2985 = vst [vmem:[%s5436_s20 + $0x20] sm:$0xff] %v2921_v42  ;;  %2987 = vst [vmem:[%s5436_s20 + $0x30] sm:$0xff] %v2923_v34  ;;  %v2607_v10 = vadd.f32 %v2606_v60, %v5406_v0  ;;  %v2720_v19 = vadd.f32 %v2719_v4, %v5408_v39  ;;  %v2608_v15 = vpop.f32.mrb[109].mxu1  ;;  %v2721_v62 = vpop.f32.mrb[125].mxu0  ;;  %v3314_v8 = vld [vmem:[%s4449_s16 + $0xe0] sm:$0xff]  ;;  %v3316_v57 = vld [vmem:[%s4449_s16 + $0xf0] sm:$0xff] }
 0x358   : > { %2986 = vst [vmem:[%s5436_s20 + $0x28] sm:$0xff] %v2922_v43  ;;  %2988 = vst [vmem:[%s5436_s20 + $0x38] sm:$0xff] %v2924_v41  ;;  %v2609_v48 = vadd.f32 %v2608_v15, %v5411_v1  ;;  %v2722_v2 = vadd.f32 %v2721_v62, %v5413_v47  ;;  %v2610_v49 = vpop.f32.mrb[110].mxu1  ;;  %v2723_v25 = vpop.f32.mrb[126].mxu0 }
 0x359   : > { %v2861_v31 = vadd.f32 %v3302_v14, %v2607_v10  ;;  %v2863_v35 = vadd.f32 %v3304_v38, %v2720_v19  ;;  %v2611_v44 = vadd.f32 %v2610_v49, %v5406_v0  ;;  %v2724_v45 = vadd.f32 %v2723_v25, %v5408_v39  ;;  %v2612_v51 = vpop.f32.mrb[111].mxu1  ;;  %v2725_v56 = vpop.f32.mrb[127].mxu0  ;;  %v3315_v14 = vld [vmem:[%s4449_s16 + $0xe8] sm:$0xff]  ;;  %v3317_v38 = vld [vmem:[%s4449_s16 + $0xf8] sm:$0xff] }
 0x35a   : > { %v2862_v63 = vadd.f32 %v3303_v16, %v2609_v48  ;;  %v2864_v12 = vadd.f32 %v3305_v17, %v2722_v2  ;;  %v2613_v50 = vadd.f32 %v2612_v51, %v5411_v1  ;;  %v2726_v54 = vadd.f32 %v2725_v56, %v5413_v47 }
 0x35b   : > { %v2925_v33 = vmax.f32 %v2861_v31, 0.0  ;;  %v2927_v3 = vmax.f32 %v2863_v35, 0.0  ;;  %v2865_v59 = vadd.f32 %v3306_v22, %v2611_v44  ;;  %v2867_v13 = vadd.f32 %v3308_v27, %v2724_v45 }
 0x35c   : > { %v2926_v40 = vmax.f32 %v2862_v63, 0.0  ;;  %v2928_v23 = vmax.f32 %v2864_v12, 0.0  ;;  %v2866_v11 = vadd.f32 %v3307_v46, %v2613_v50  ;;  %v2868_v36 = vadd.f32 %v3309_v20, %v2726_v54  ;;  %v3318_v46 = vld [vmem:[%s4449_s16 + $0x100] sm:$0xff]  ;;  %v3320_v20 = vld [vmem:[%s4449_s16 + $0x110] sm:$0xff]  ;;  %v3319_v54 = vld [vmem:[%s4449_s16 + $0x108] sm:$0xff] }
 0x35d   : > { %2989 = vst [vmem:[%s5436_s20 + $0x40] sm:$0xff] %v2925_v33  ;;  %2991 = vst [vmem:[%s5436_s20 + $0x50] sm:$0xff] %v2927_v3  ;;  %v2929_v7 = vmax.f32 %v2865_v59, 0.0  ;;  %v2931_v28 = vmax.f32 %v2867_v13, 0.0  ;;  %v3321_v3 = vld [vmem:[%s4449_s16 + $0x118] sm:$0xff] }
 0x35e   : > { %2990 = vst [vmem:[%s5436_s20 + $0x48] sm:$0xff] %v2926_v40  ;;  %2992 = vst [vmem:[%s5436_s20 + $0x58] sm:$0xff] %v2928_v23  ;;  %v2930_v29 = vmax.f32 %v2866_v11, 0.0  ;;  %v2932_v24 = vmax.f32 %v2868_v36, 0.0  ;;  %v2616_v32 = vpop.f32.mrb[112].mxu1  ;;  %v2729_v18 = vpop.f32.mrb[128].mxu0 }
 0x35f   : > { %2993 = vst [vmem:[%s5436_s20 + $0x60] sm:$0xff] %v2929_v7  ;;  %2995 = vst [vmem:[%s5436_s20 + $0x70] sm:$0xff] %v2931_v28  ;;  %v2617_v30 = vadd.f32 %v2616_v32, %v5406_v0  ;;  %v2730_v53 = vadd.f32 %v2729_v18, %v5408_v39  ;;  %v2618_v58 = vpop.f32.mrb[113].mxu1  ;;  %v2731_v26 = vpop.f32.mrb[129].mxu0  ;;  %v3322_v23 = vld [vmem:[%s4449_s16 + $0x120] sm:$0xff]  ;;  %v3324_v36 = vld [vmem:[%s4449_s16 + $0x130] sm:$0xff] }
 0x360   : > { %2994 = vst [vmem:[%s5436_s20 + $0x68] sm:$0xff] %v2930_v29  ;;  %2996 = vst [vmem:[%s5436_s20 + $0x78] sm:$0xff] %v2932_v24  ;;  %v2619_v5 = vadd.f32 %v2618_v58, %v5411_v1  ;;  %v2732_v9 = vadd.f32 %v2731_v26, %v5413_v47  ;;  %v2620_v6 = vpop.f32.mrb[114].mxu1  ;;  %v2733_v21 = vpop.f32.mrb[130].mxu0 }
 0x361   : > { %v2869_v42 = vadd.f32 %v3310_v55, %v2617_v30  ;;  %v2871_v34 = vadd.f32 %v3312_v37, %v2730_v53  ;;  %v2621_v43 = vadd.f32 %v2620_v6, %v5406_v0  ;;  %v2734_v41 = vadd.f32 %v2733_v21, %v5408_v39  ;;  %v2622_v60 = vpop.f32.mrb[115].mxu1  ;;  %v2735_v4 = vpop.f32.mrb[131].mxu0  ;;  %v3323_v55 = vld [vmem:[%s4449_s16 + $0x128] sm:$0xff]  ;;  %v3325_v37 = vld [vmem:[%s4449_s16 + $0x138] sm:$0xff] }
 0x362   : > { %v2870_v10 = vadd.f32 %v3311_v61, %v2619_v5  ;;  %v2872_v19 = vadd.f32 %v3313_v52, %v2732_v9  ;;  %v2623_v15 = vadd.f32 %v2622_v60, %v5411_v1  ;;  %v2736_v16 = vadd.f32 %v2735_v4, %v5413_v47 }
 0x363   : > { %v2933_v62 = vmax.f32 %v2869_v42, 0.0  ;;  %v2935_v17 = vmax.f32 %v2871_v34, 0.0  ;;  %v2873_v48 = vadd.f32 %v3314_v8, %v2621_v43  ;;  %v2875_v2 = vadd.f32 %v3316_v57, %v2734_v41 }
 0x364   : > { %v2934_v49 = vmax.f32 %v2870_v10, 0.0  ;;  %v2936_v22 = vmax.f32 %v2872_v19, 0.0  ;;  %v2874_v25 = vadd.f32 %v3315_v14, %v2623_v15  ;;  %v2876_v27 = vadd.f32 %v3317_v38, %v2736_v16  ;;  %v3326_v14 = vld [vmem:[%s4449_s16 + $0x140] sm:$0xff]  ;;  %v3328_v38 = vld [vmem:[%s4449_s16 + $0x150] sm:$0xff]  ;;  %v3327_v16 = vld [vmem:[%s4449_s16 + $0x148] sm:$0xff] }
 0x365   : > { %2997 = vst [vmem:[%s5436_s20 + $0x80] sm:$0xff] %v2933_v62  ;;  %2999 = vst [vmem:[%s5436_s20 + $0x90] sm:$0xff] %v2935_v17  ;;  %v2937_v31 = vmax.f32 %v2873_v48, 0.0  ;;  %v2939_v35 = vmax.f32 %v2875_v2, 0.0  ;;  %v3329_v17 = vld [vmem:[%s4449_s16 + $0x158] sm:$0xff] }
 0x366   : > { %2998 = vst [vmem:[%s5436_s20 + $0x88] sm:$0xff] %v2934_v49  ;;  %3000 = vst [vmem:[%s5436_s20 + $0x98] sm:$0xff] %v2936_v22  ;;  %v2938_v44 = vmax.f32 %v2874_v25, 0.0  ;;  %v2940_v45 = vmax.f32 %v2876_v27, 0.0  ;;  %v2626_v51 = vpop.f32.mrb[116].mxu1  ;;  %v2739_v56 = vpop.f32.mrb[132].mxu0 }
 0x367   : > { %3001 = vst [vmem:[%s5436_s20 + $0xa0] sm:$0xff] %v2937_v31  ;;  %3003 = vst [vmem:[%s5436_s20 + $0xb0] sm:$0xff] %v2939_v35  ;;  %v2627_v63 = vadd.f32 %v2626_v51, %v5406_v0  ;;  %v2740_v12 = vadd.f32 %v2739_v56, %v5408_v39  ;;  %v2628_v50 = vpop.f32.mrb[117].mxu1  ;;  %v2741_v33 = vpop.f32.mrb[133].mxu0  ;;  %v3330_v22 = vld [vmem:[%s4449_s16 + $0x160] sm:$0xff]  ;;  %v3332_v27 = vld [vmem:[%s4449_s16 + $0x170] sm:$0xff] }
 0x368   : > { %3002 = vst [vmem:[%s5436_s20 + $0xa8] sm:$0xff] %v2938_v44  ;;  %3004 = vst [vmem:[%s5436_s20 + $0xb8] sm:$0xff] %v2940_v45  ;;  %v2629_v59 = vadd.f32 %v2628_v50, %v5411_v1  ;;  %v2742_v13 = vadd.f32 %v2741_v33, %v5413_v47  ;;  %v2630_v40 = vpop.f32.mrb[118].mxu1  ;;  %v2743_v11 = vpop.f32.mrb[134].mxu0 }
 0x369   : > { %v2877_v7 = vadd.f32 %v3318_v46, %v2627_v63  ;;  %v2879_v28 = vadd.f32 %v3320_v20, %v2740_v12  ;;  %v2631_v29 = vadd.f32 %v2630_v40, %v5406_v0  ;;  %v2744_v24 = vadd.f32 %v2743_v11, %v5408_v39  ;;  %v2632_v32 = vpop.f32.mrb[119].mxu1  ;;  %v2745_v18 = vpop.f32.mrb[135].mxu0  ;;  %v3331_v46 = vld [vmem:[%s4449_s16 + $0x168] sm:$0xff]  ;;  %v3333_v20 = vld [vmem:[%s4449_s16 + $0x178] sm:$0xff] }
 0x36a   : > { %v2878_v30 = vadd.f32 %v3319_v54, %v2629_v59  ;;  %v2880_v53 = vadd.f32 %v3321_v3, %v2742_v13  ;;  %v2633_v58 = vadd.f32 %v2632_v32, %v5411_v1  ;;  %v2746_v61 = vadd.f32 %v2745_v18, %v5413_v47 }
 0x36b   : > { %v2941_v26 = vmax.f32 %v2877_v7, 0.0  ;;  %v2943_v52 = vmax.f32 %v2879_v28, 0.0  ;;  %v2881_v5 = vadd.f32 %v3322_v23, %v2631_v29  ;;  %v2883_v9 = vadd.f32 %v3324_v36, %v2744_v24 }
 0x36c   : > { %v2942_v6 = vmax.f32 %v2878_v30, 0.0  ;;  %v2944_v8 = vmax.f32 %v2880_v53, 0.0  ;;  %v2882_v21 = vadd.f32 %v3323_v55, %v2633_v58  ;;  %v2884_v57 = vadd.f32 %v3325_v37, %v2746_v61  ;;  %v3334_v55 = vld [vmem:[%s4449_s16 + $0x180] sm:$0xff]  ;;  %v3336_v37 = vld [vmem:[%s4449_s16 + $0x190] sm:$0xff]  ;;  %v3335_v61 = vld [vmem:[%s4449_s16 + $0x188] sm:$0xff] }
 0x36d   : > { %3005 = vst [vmem:[%s5436_s20 + $0xc0] sm:$0xff] %v2941_v26  ;;  %3007 = vst [vmem:[%s5436_s20 + $0xd0] sm:$0xff] %v2943_v52  ;;  %v2945_v42 = vmax.f32 %v2881_v5, 0.0  ;;  %v2947_v34 = vmax.f32 %v2883_v9, 0.0  ;;  %v3337_v52 = vld [vmem:[%s4449_s16 + $0x198] sm:$0xff] }
 0x36e   : > { %3006 = vst [vmem:[%s5436_s20 + $0xc8] sm:$0xff] %v2942_v6  ;;  %3008 = vst [vmem:[%s5436_s20 + $0xd8] sm:$0xff] %v2944_v8  ;;  %v2946_v43 = vmax.f32 %v2882_v21, 0.0  ;;  %v2948_v41 = vmax.f32 %v2884_v57, 0.0  ;;  %v2636_v60 = vpop.f32.mrb[120].mxu1  ;;  %v2749_v4 = vpop.f32.mrb[136].mxu0 }
 0x36f   : > { %3009 = vst [vmem:[%s5436_s20 + $0xe0] sm:$0xff] %v2945_v42  ;;  %3011 = vst [vmem:[%s5436_s20 + $0xf0] sm:$0xff] %v2947_v34  ;;  %v2637_v10 = vadd.f32 %v2636_v60, %v5406_v0  ;;  %v2750_v19 = vadd.f32 %v2749_v4, %v5408_v39  ;;  %v2638_v15 = vpop.f32.mrb[121].mxu1  ;;  %v2751_v62 = vpop.f32.mrb[137].mxu0  ;;  %v3338_v8 = vld [vmem:[%s4449_s16 + $0x1a0] sm:$0xff]  ;;  %v3340_v57 = vld [vmem:[%s4449_s16 + $0x1b0] sm:$0xff] }
 0x370   : > { %3010 = vst [vmem:[%s5436_s20 + $0xe8] sm:$0xff] %v2946_v43  ;;  %3012 = vst [vmem:[%s5436_s20 + $0xf8] sm:$0xff] %v2948_v41  ;;  %v2639_v48 = vadd.f32 %v2638_v15, %v5411_v1  ;;  %v2752_v2 = vadd.f32 %v2751_v62, %v5413_v47  ;;  %v2640_v49 = vpop.f32.mrb[122].mxu1  ;;  %v2753_v25 = vpop.f32.mrb[138].mxu0 }
 0x371   : > { %v2885_v31 = vadd.f32 %v3326_v14, %v2637_v10  ;;  %v2887_v35 = vadd.f32 %v3328_v38, %v2750_v19  ;;  %v2641_v44 = vadd.f32 %v2640_v49, %v5406_v0  ;;  %v2754_v45 = vadd.f32 %v2753_v25, %v5408_v39  ;;  %v2642_v51 = vpop.f32.mrb[123].mxu1  ;;  %v2755_v56 = vpop.f32.mrb[139].mxu0  ;;  %v3339_v14 = vld [vmem:[%s4449_s16 + $0x1a8] sm:$0xff]  ;;  %v3341_v38 = vld [vmem:[%s4449_s16 + $0x1b8] sm:$0xff] }
 0x372   : > { %v2886_v63 = vadd.f32 %v3327_v16, %v2639_v48  ;;  %v2888_v12 = vadd.f32 %v3329_v17, %v2752_v2  ;;  %v2643_v50 = vadd.f32 %v2642_v51, %v5411_v1  ;;  %v2756_v54 = vadd.f32 %v2755_v56, %v5413_v47 }
 0x373   : > { %v2949_v33 = vmax.f32 %v2885_v31, 0.0  ;;  %v2951_v3 = vmax.f32 %v2887_v35, 0.0  ;;  %v2889_v59 = vadd.f32 %v3330_v22, %v2641_v44  ;;  %v2891_v13 = vadd.f32 %v3332_v27, %v2754_v45 }
 0x374   : > { %v2950_v40 = vmax.f32 %v2886_v63, 0.0  ;;  %v2952_v23 = vmax.f32 %v2888_v12, 0.0  ;;  %v2890_v11 = vadd.f32 %v3331_v46, %v2643_v50  ;;  %v2892_v36 = vadd.f32 %v3333_v20, %v2756_v54  ;;  %v3342_v46 = vld [vmem:[%s4449_s16 + $0x1c0] sm:$0xff]  ;;  %v3343_v63 = vld [vmem:[%s4449_s16 + $0x1c8] sm:$0xff] }
 0x375   : > { %3013 = vst [vmem:[%s5436_s20 + $0x100] sm:$0xff] %v2949_v33  ;;  %3015 = vst [vmem:[%s5436_s20 + $0x110] sm:$0xff] %v2951_v3  ;;  %v2953_v7 = vmax.f32 %v2889_v59, 0.0  ;;  %v2955_v28 = vmax.f32 %v2891_v13, 0.0  ;;  %v3346_v54 = vld [vmem:[%s4449_s16 + $0x1e0] sm:$0xff]  ;;  %v3347_v13 = vld [vmem:[%s4449_s16 + $0x1e8] sm:$0xff] }
 0x376   : > { %3014 = vst [vmem:[%s5436_s20 + $0x108] sm:$0xff] %v2950_v40  ;;  %3016 = vst [vmem:[%s5436_s20 + $0x118] sm:$0xff] %v2952_v23  ;;  %v2954_v29 = vmax.f32 %v2890_v11, 0.0  ;;  %v2956_v24 = vmax.f32 %v2892_v36, 0.0  ;;  %v2646_v32 = vpop.f32.mrb[124].mxu1  ;;  %v2759_v18 = vpop.f32.mrb[140].mxu0 }
 0x377   : > { %3017 = vst [vmem:[%s5436_s20 + $0x120] sm:$0xff] %v2953_v7  ;;  %3019 = vst [vmem:[%s5436_s20 + $0x130] sm:$0xff] %v2955_v28  ;;  %v2647_v30 = vadd.f32 %v2646_v32, %v5406_v0  ;;  %v2760_v53 = vadd.f32 %v2759_v18, %v5408_v39  ;;  %v2648_v58 = vpop.f32.mrb[125].mxu1  ;;  %v2761_v26 = vpop.f32.mrb[141].mxu0 }
 0x378   : > { %3018 = vst [vmem:[%s5436_s20 + $0x128] sm:$0xff] %v2954_v29  ;;  %3020 = vst [vmem:[%s5436_s20 + $0x138] sm:$0xff] %v2956_v24  ;;  %v2649_v5 = vadd.f32 %v2648_v58, %v5411_v1  ;;  %v2762_v9 = vadd.f32 %v2761_v26, %v5413_v47  ;;  %v2650_v6 = vpop.f32.mrb[126].mxu1  ;;  %v2763_v21 = vpop.f32.mrb[142].mxu0 }
 0x379   : > { %v2893_v42 = vadd.f32 %v3334_v55, %v2647_v30  ;;  %v2895_v34 = vadd.f32 %v3336_v37, %v2760_v53  ;;  %v2651_v43 = vadd.f32 %v2650_v6, %v5406_v0  ;;  %v2764_v41 = vadd.f32 %v2763_v21, %v5408_v39  ;;  %v2652_v60 = vpop.f32.mrb[127].mxu1  ;;  %v2765_v4 = vpop.f32.mrb[143].mxu0  ;;  %v3350_v55 = vld [vmem:[%s4449_s16 + $0x200] sm:$0xff]  ;;  %v3351_v30 = vld [vmem:[%s4449_s16 + $0x208] sm:$0xff] }
 0x37a   : > { %v2894_v10 = vadd.f32 %v3335_v61, %v2649_v5  ;;  %v2896_v19 = vadd.f32 %v3337_v52, %v2762_v9  ;;  %v2653_v15 = vadd.f32 %v2652_v60, %v5411_v1  ;;  %v2766_v16 = vadd.f32 %v2765_v4, %v5413_v47  ;;  %v3354_v61 = vld [vmem:[%s4449_s16 + $0x220] sm:$0xff]  ;;  %v3355_v9 = vld [vmem:[%s4449_s16 + $0x228] sm:$0xff] }
 0x37b   : > { %v2957_v62 = vmax.f32 %v2893_v42, 0.0  ;;  %v2959_v17 = vmax.f32 %v2895_v34, 0.0  ;;  %v2897_v48 = vadd.f32 %v3338_v8, %v2651_v43  ;;  %v2899_v2 = vadd.f32 %v3340_v57, %v2764_v41 }
 0x37c   : > { %v2958_v49 = vmax.f32 %v2894_v10, 0.0  ;;  %v2960_v22 = vmax.f32 %v2896_v19, 0.0  ;;  %v2898_v25 = vadd.f32 %v3339_v14, %v2653_v15  ;;  %v2900_v27 = vadd.f32 %v3341_v38, %v2766_v16  ;;  %v3344_v14 = vld [vmem:[%s4449_s16 + $0x1d0] sm:$0xff]  ;;  %v3345_v38 = vld [vmem:[%s4449_s16 + $0x1d8] sm:$0xff] }
 0x37d   : > { %3021 = vst [vmem:[%s5436_s20 + $0x140] sm:$0xff] %v2957_v62  ;;  %3023 = vst [vmem:[%s5436_s20 + $0x150] sm:$0xff] %v2959_v17  ;;  %v2961_v31 = vmax.f32 %v2897_v48, 0.0  ;;  %v2963_v35 = vmax.f32 %v2899_v2, 0.0  ;;  %v3348_v19 = vld [vmem:[%s4449_s16 + $0x1f0] sm:$0xff]  ;;  %v3349_v17 = vld [vmem:[%s4449_s16 + $0x1f8] sm:$0xff] }
 0x37e   : > { %3022 = vst [vmem:[%s5436_s20 + $0x148] sm:$0xff] %v2958_v49  ;;  %3024 = vst [vmem:[%s5436_s20 + $0x158] sm:$0xff] %v2960_v22  ;;  %v2962_v44 = vmax.f32 %v2898_v25, 0.0  ;;  %v2964_v45 = vmax.f32 %v2900_v27, 0.0  ;;  %v2656_v51 = vpop.f32.mrb[128].mxu1 }
 0x37f   : > { %3025 = vst [vmem:[%s5436_s20 + $0x160] sm:$0xff] %v2961_v31  ;;  %3027 = vst [vmem:[%s5436_s20 + $0x170] sm:$0xff] %v2963_v35  ;;  %v2657_v56 = vadd.f32 %v2656_v51, %v5406_v0  ;;  %v2658_v20 = vpop.f32.mrb[129].mxu1 }
 0x380   : > { %3026 = vst [vmem:[%s5436_s20 + $0x168] sm:$0xff] %v2962_v44  ;;  %3028 = vst [vmem:[%s5436_s20 + $0x178] sm:$0xff] %v2964_v45  ;;  %v2659_v12 = vadd.f32 %v2658_v20, %v5411_v1  ;;  %v2660_v50 = vpop.f32.mrb[130].mxu1  ;;  %v3352_v45 = vld [vmem:[%s4449_s16 + $0x210] sm:$0xff] }
 0x381   : > { %v2901_v33 = vadd.f32 %v3342_v46, %v2657_v56  ;;  %v2661_v3 = vadd.f32 %v2660_v50, %v5406_v0  ;;  %v2662_v59 = vpop.f32.mrb[131].mxu1  ;;  %v3353_v56 = vld [vmem:[%s4449_s16 + $0x218] sm:$0xff] }
 0x382   : > { %v2902_v40 = vadd.f32 %v3343_v63, %v2659_v12  ;;  %v2663_v23 = vadd.f32 %v2662_v59, %v5411_v1  ;;  %v3356_v12 = vld [vmem:[%s4449_s16 + $0x230] sm:$0xff] }
 0x383   : > { %v2965_v11 = vmax.f32 %v2901_v33, 0.0  ;;  %v2905_v36 = vadd.f32 %v3346_v54, %v2661_v3  ;;  %v3357_v3 = vld [vmem:[%s4449_s16 + $0x238] sm:$0xff]  ;;  %s5626_s16 = scalar_lea.sflag [#allocation4], %s293_s23 }
 0x384   : > { %v2966_v7 = vmax.f32 %v2902_v40, 0.0  ;;  %v2906_v28 = vadd.f32 %v3347_v13, %v2663_v23 }
 0x385   : > { %3029 = vst [vmem:[%s5436_s20 + $0x180] sm:$0xff] %v2965_v11  ;;  %v2969_v29 = vmax.f32 %v2905_v36, 0.0 }
 0x386   : > { %3030 = vst [vmem:[%s5436_s20 + $0x188] sm:$0xff] %v2966_v7  ;;  %v2970_v24 = vmax.f32 %v2906_v28, 0.0  ;;  %v2666_v32 = vpop.f32.mrb[132].mxu1 }
 0x387   : > { %3033 = vst [vmem:[%s5436_s20 + $0x1a0] sm:$0xff] %v2969_v29  ;;  %v2667_v18 = vadd.f32 %v2666_v32, %v5406_v0  ;;  %v2668_v37 = vpop.f32.mrb[133].mxu1 }
 0x388   : > { %3034 = vst [vmem:[%s5436_s20 + $0x1a8] sm:$0xff] %v2970_v24  ;;  %v2669_v53 = vadd.f32 %v2668_v37, %v5411_v1  ;;  %v2670_v58 = vpop.f32.mrb[134].mxu1 }
 0x389   : > { %v2909_v26 = vadd.f32 %v3350_v55, %v2667_v18  ;;  %v2671_v52 = vadd.f32 %v2670_v58, %v5406_v0  ;;  %v2672_v5 = vpop.f32.mrb[135].mxu1 }
 0x38a   : > { %v2910_v6 = vadd.f32 %v3351_v30, %v2669_v53  ;;  %v2673_v8 = vadd.f32 %v2672_v5, %v5411_v1 }
 0x38b   : > { %v2973_v21 = vmax.f32 %v2909_v26, 0.0  ;;  %v2913_v57 = vadd.f32 %v3354_v61, %v2671_v52 }
 0x38c   : > { %v2974_v42 = vmax.f32 %v2910_v6, 0.0  ;;  %v2914_v34 = vadd.f32 %v3355_v9, %v2673_v8 }
 0x38d   : > { %3037 = vst [vmem:[%s5436_s20 + $0x1c0] sm:$0xff] %v2973_v21  ;;  %v2977_v43 = vmax.f32 %v2913_v57, 0.0 }
 0x38e   : > { %3038 = vst [vmem:[%s5436_s20 + $0x1c8] sm:$0xff] %v2974_v42  ;;  %v2978_v41 = vmax.f32 %v2914_v34, 0.0  ;;  %v2769_v60 = vpop.f32.mrb[136].mxu1 }
 0x38f   : > { %3041 = vst [vmem:[%s5436_s20 + $0x1e0] sm:$0xff] %v2977_v43  ;;  %v2770_v0 = vadd.f32 %v2769_v60, %v5408_v39  ;;  %v2771_v4 = vpop.f32.mrb[137].mxu1 }
 0x390   : > { %3042 = vst [vmem:[%s5436_s20 + $0x1e8] sm:$0xff] %v2978_v41  ;;  %v2772_v1 = vadd.f32 %v2771_v4, %v5413_v47  ;;  %v2773_v10 = vpop.f32.mrb[138].mxu1 }
 0x391   : > { %v2903_v15 = vadd.f32 %v3344_v14, %v2770_v0  ;;  %v2774_v16 = vadd.f32 %v2773_v10, %v5408_v39  ;;  %v2775_v62 = vpop.f32.mrb[139].mxu1 }
 0x392   : > { %v2904_v48 = vadd.f32 %v3345_v38, %v2772_v1  ;;  %v2776_v2 = vadd.f32 %v2775_v62, %v5413_v47 }
 0x393   : > { %v2967_v49 = vmax.f32 %v2903_v15, 0.0  ;;  %v2907_v22 = vadd.f32 %v3348_v19, %v2774_v16 }
 0x394   : > { %v2968_v25 = vmax.f32 %v2904_v48, 0.0  ;;  %v2908_v27 = vadd.f32 %v3349_v17, %v2776_v2 }
 0x395   : > { %3031 = vst [vmem:[%s5436_s20 + $0x190] sm:$0xff] %v2967_v49  ;;  %v2971_v31 = vmax.f32 %v2907_v22, 0.0 }
 0x396   : > { %3032 = vst [vmem:[%s5436_s20 + $0x198] sm:$0xff] %v2968_v25  ;;  %v2972_v35 = vmax.f32 %v2908_v27, 0.0  ;;  %v2779_v44 = vpop.f32.mrb[140].mxu1 }
 0x397   : > { %3035 = vst [vmem:[%s5436_s20 + $0x1b0] sm:$0xff] %v2971_v31  ;;  %v2780_v51 = vadd.f32 %v2779_v44, %v5408_v39  ;;  %v2781_v46 = vpop.f32.mrb[141].mxu1 }
 0x398   : > { %3036 = vst [vmem:[%s5436_s20 + $0x1b8] sm:$0xff] %v2972_v35  ;;  %v2782_v20 = vadd.f32 %v2781_v46, %v5413_v47  ;;  %v2783_v63 = vpop.f32.mrb[142].mxu1 }
 0x399   : > { %v2911_v50 = vadd.f32 %v3352_v45, %v2780_v51  ;;  %v2784_v54 = vadd.f32 %v2783_v63, %v5408_v39  ;;  %v2785_v33 = vpop.f32.mrb[143].mxu1 }
 0x39a   : > { %v2912_v59 = vadd.f32 %v3353_v56, %v2782_v20  ;;  %v2786_v13 = vadd.f32 %v2785_v33, %v5413_v47 }
 0x39b   : > { %v2975_v40 = vmax.f32 %v2911_v50, 0.0  ;;  %v2915_v23 = vadd.f32 %v3356_v12, %v2784_v54 }
 0x39c   : > { %v2976_v11 = vmax.f32 %v2912_v59, 0.0  ;;  %v2916_v36 = vadd.f32 %v3357_v3, %v2786_v13 }
 0x39d   : > { %3039 = vst [vmem:[%s5436_s20 + $0x1d0] sm:$0xff] %v2975_v40  ;;  %v2979_v7 = vmax.f32 %v2915_v23, 0.0 }
 0x39e   : > { %3040 = vst [vmem:[%s5436_s20 + $0x1d8] sm:$0xff] %v2976_v11  ;;  %v2980_v39 = vmax.f32 %v2916_v36, 0.0 }
 0x39f   : > { %3043 = vst [vmem:[%s5436_s20 + $0x1f0] sm:$0xff] %v2979_v7 }
 0x3a0   : > { %3044 = vst [vmem:[%s5436_s20 + $0x1f8] sm:$0xff] %v2980_v39 }
 0x3a1   : > { %4152 = shalt.err (!%p4149_p7)
}
 0x3a2   : > { %s4153_s23 = scalar_lea.hbm %s5617_s9, 8192  ;;  %s4157_s11 = scalar_lea.hbm %s5685_s7, 32768 }
 0x3a3   : > { %p4154_p9 = scmp.ne.s32.totalorder %s5617_s9, %s4153_s23  ;;  %p4158_p12 = scmp.lt.u32.totalorder %s5617_s9, %s5685_s7 }
 0x3a4   : > { %p4159_p13 = scmp.lt.u32.totalorder %s4157_s11, %s4153_s23  ;;  %p4161_p1 = scmp.lt.u32.totalorder %s4153_s23, %s5617_s9 }
 0x3a5   : > { %p4155_p10 = pnand %p4154_p9, %p4332_p3 }
 0x3a6   : > { %p4160_p0 = por %p4159_p13, %p4158_p12 }
 0x3a7   : > { %p4156_p11 = pneg %p4155_p10 }
 0x3a8   : > { %p4162_p2 = por %p4161_p1, %p4160_p0 }
 0x3aa   : > { %p4163_p4 = pnand %p4162_p2, %p4156_p11 }
 0x3ac   : > { %4166 = shalt.err (!%p4163_p4)
}
 0x3ad   : > { %s4239_s22 = smov 512   ;;  %s4240_s10 = smov 32  }
 0x3ae   : > { %3840 = dma.vmem_to_hbm [thread:$0]  (%p4332_p3), %s5619_s28, 8192, %s5617_s9, %s5626_s16, %s4239_s22, %s4239_s22, %s4240_s10  }
 0x3af PF: > { %p3846_p5 = scmp.ge.s32.totalorder %s4233_s8, 2  ;;  %s3077_s13 = sand.u32 1, %s4205_s24  }
 0x3b0   : > { %s3078_s17 = scalar_lea.sflag [#allocation4], %s3077_s13 }
 0x3b1   : > { %p3843_p6 = pnand %p3846_p5, %p4341_p8 }
 0x3b3   : > { %4200 = dma.done.wait (!%p3843_p6), %s3078_s17, 8192  }
 0x3b4   : > { %4202 = vsyncadd (!%p3843_p6), %s3078_s17, 4294959104  ;;  %s20_s8 = sadd.s32 1, %s4233_s8   ;;  %s5724_s14 = sld [smem:[#allocation6_spill]] }
 0x3b5   : > { %p17_p7 = scmp.ge.s32.totalorder %s20_s8, 6   ;;  %s5725_s9 = sld [smem:[#allocation7_spill]] }
 0x3b6   : > { %s5726_s24 = smov %s4209_s25  ;;  %s5727_s25 = smov %s4213_s26 }
 0x3b7   : > { %s5728_s26 = smov %s4350_s19  ;;  %s5729_s27 = smov %s4225_s29 }
 0x3b8   : > { %s5730_s28 = smov %s4229_s30  ;;  %19 = sbr.rel (!%p17_p7) target bundleno = 5 (0x5), region = 86 }
 0x3ba   : > { %s5731_s29 = smov %s5724_s14 }
 0x3bb   : > { %s5732_s30 = smov %s5725_s9 }
 0x3bf   :  { %3083 = vsyncpa [#allocation4], 1 }
 0x3c0   :  { %3085 = vsyncpa [#allocation4 + $0x1], 1 }

</bundles_post_ra>
